<compile_context>
chip_gen: v7x
topology: tpu7x:2x2x1
jax: 0.10.0
libtpu: 0.0.40
codegen_flags: <defaults>
</compile_context>

<pallas_src>
import functools
import math

import jax
import jax.numpy as jnp
from jax.experimental import pallas as pl
from jax.experimental.pallas import tpu as pltpu

EPS = 1e-5        # nn.BatchNorm2d default eps
LANES = 128       # lane-dense channel padding

# Raise scoped VMEM above the 16 MiB (v5e) / 32 MiB (v6e,v7x) defaults while
# staying comfortably under v7x's 64 MiB physical VMEM.
VMEM_LIMIT_BYTES = 48 * 1024 * 1024

_MOSAIC_PARAMS = pltpu.CompilerParams(
    dimension_semantics=("parallel",),      # batch grid axis -> both cores
    vmem_limit_bytes=VMEM_LIMIT_BYTES,
)


def _round_up(x, m):
    return (x + m - 1) // m * m


def _nbytes(shape, dtype):
    return math.prod(shape) * jnp.dtype(dtype).itemsize


# ---------------------------------------------------------------------------
# In-kernel helpers.
# ---------------------------------------------------------------------------
def _tap_matmul_f32(xf, w_ref, *, ksize, stride, hh, ho, wo):
    """Implicit-GEMM KxK conv for one image.

    xf: (stride*stride*hh, wh, cin) f32 phase-stacked padded input slab.
    w_ref: (ksize*ksize, cin, cpad) bf16 weight taps.
    Returns the (ho*wo, cpad) f32 accumulator.
    """
    cin = xf.shape[-1]
    cpad = w_ref.shape[-1]
    acc = jnp.zeros((ho * wo, cpad), jnp.float32)
    tap = 0
    for kh in range(ksize):
        for kw in range(ksize):
            phase = (kh % stride) * stride + (kw % stride)
            r0 = phase * hh + kh // stride
            c0 = kw // stride
            patch = xf[r0:r0 + ho, c0:c0 + wo, :]
            patch = patch.reshape(ho * wo, cin).astype(jnp.bfloat16)
            acc = acc + jnp.dot(patch, w_ref[tap],
                                preferred_element_type=jnp.float32)
            tap += 1
    return acc


def _store_stats(stats_ref, acc, count, base):
    """Per-tile BN partials from the f32 accumulator (before any bf16 cast):
    row `base` = sum, row `base+1` = centered sum-of-squares (M2)."""
    s = jnp.sum(acc, axis=0, keepdims=True)           # (1, cpad)
    d = acc - s * (1.0 / count)
    m2 = jnp.sum(d * d, axis=0, keepdims=True)
    stats_ref[0, base:base + 1, :] = s
    stats_ref[0, base + 1:base + 2, :] = m2


# ---------------------------------------------------------------------------
# Pass-1 kernels: conv as implicit GEMM (bf16 MXU, f32 accumulate) + stats.
# ---------------------------------------------------------------------------
def _conv1_kernel(x_ref, w_ref, z_ref, stats_ref, *, ksize, stride, hh, ho, wo):
    xf = x_ref[0].astype(jnp.float32)
    acc = _tap_matmul_f32(xf, w_ref, ksize=ksize, stride=stride,
                          hh=hh, ho=ho, wo=wo)
    stats_ref[...] = jnp.zeros_like(stats_ref)
    _store_stats(stats_ref, acc, ho * wo, 0)
    z_ref[0] = acc.reshape(ho, wo, -1).astype(z_ref.dtype)


def _conv1_shortcut_kernel(x_ref, w_ref, wsc_ref, z_ref, zsc_ref, stats_ref,
                           *, ksize, stride, hh, ho, wo):
    xf = x_ref[0].astype(jnp.float32)
    acc = _tap_matmul_f32(xf, w_ref, ksize=ksize, stride=stride,
                          hh=hh, ho=ho, wo=wo)
    # Fused 1x1 stride-2 shortcut conv: with pad=1 the shortcut input
    # x[2i, 2j] is exactly phase (1,1) of the already-resident slab at
    # offset (0, 0) — zero extra input DMA.
    p = stride * 1 + 1
    xs = xf[p * hh:p * hh + ho, 0:wo, :]
    xs = xs.reshape(ho * wo, -1).astype(jnp.bfloat16)
    acc_sc = jnp.dot(xs, wsc_ref[...], preferred_element_type=jnp.float32)

    stats_ref[...] = jnp.zeros_like(stats_ref)
    _store_stats(stats_ref, acc, ho * wo, 0)
    _store_stats(stats_ref, acc_sc, ho * wo, 2)
    z_ref[0] = acc.reshape(ho, wo, -1).astype(z_ref.dtype)
    zsc_ref[0] = acc_sc.reshape(ho, wo, -1).astype(zsc_ref.dtype)


def _conv2_kernel(z1p_ref, aff_ref, w_ref, z2_ref, stats_ref, *, ho, wo):
    """Fused BN1-apply + ReLU + implicit-GEMM 3x3 conv2 + BN2 partial stats.

    z1p_ref holds one spatially zero-padded (halo) image of conv1's pre-BN
    output in bf16; y1 is reconstructed in VMEM and never touches HBM.
    """
    cpad = w_ref.shape[-1]
    hp, wp = ho + 2, wo + 2
    aff = aff_ref[...]
    y = z1p_ref[0].astype(jnp.float32) * aff[0:1, :] + aff[1:2, :]
    y = jnp.maximum(y, 0.0)
    # Re-zero the halo (affine(0) != 0): columns via a sublane-iota mask,
    # rows via a major-dim concat — both layout-friendly.
    col = jax.lax.broadcasted_iota(jnp.int32, (1, wp, cpad), 1)
    y = jnp.where((col >= 1) & (col <= wo), y, 0.0)
    zero_row = jnp.zeros((1, wp, cpad), jnp.float32)
    y = jnp.concatenate([zero_row, y[1:hp - 1, :, :], zero_row], axis=0)

    acc = jnp.zeros((ho * wo, cpad), jnp.float32)
    tap = 0
    for kh in range(3):
        for kw in range(3):
            patch = y[kh:kh + ho, kw:kw + wo, :]
            patch = patch.reshape(ho * wo, cpad).astype(jnp.bfloat16)
            acc = acc + jnp.dot(patch, w_ref[tap],
                                preferred_element_type=jnp.float32)
            tap += 1
    stats_ref[...] = jnp.zeros_like(stats_ref)
    _store_stats(stats_ref, acc, ho * wo, 0)
    z2_ref[0] = acc.reshape(ho, wo, cpad).astype(z2_ref.dtype)


# ---------------------------------------------------------------------------
# Pass-2 kernel: BN2-apply (+ shortcut BN-apply) + residual add + final ReLU.
# ---------------------------------------------------------------------------
def _bn_residual_relu_kernel(z_ref, r_ref, aff_ref, o_ref, *, conv_shortcut):
    aff = aff_ref[...]
    y = z_ref[0].astype(jnp.float32) * aff[0:1, :] + aff[1:2, :]
    r = r_ref[0].astype(jnp.float32)
    if conv_shortcut:
        y = y + (r * aff[2:3, :] + aff[3:4, :])
    else:
        y = y + r
    o_ref[0] = jnp.maximum(y, 0.0).astype(o_ref.dtype)


# ---------------------------------------------------------------------------
# JAX-side glue (layout only).
# ---------------------------------------------------------------------------
def _pad_dim(a, axis, size):
    if a.shape[axis] == size:
        return a
    pads = [(0, 0)] * a.ndim
    pads[axis] = (0, size - a.shape[axis])
    return jnp.pad(a, pads)


def _conv_w_to_taps(w, cin_pad, cout_pad):
    """PyTorch conv weight (Cout, Cin, kh, kw) -> (kh*kw, cin_pad, cout_pad) bf16."""
    cout, cin, kh, kw = w.shape
    taps = jnp.transpose(w, (2, 3, 1, 0)).reshape(kh * kw, cin, cout)
    taps = _pad_dim(_pad_dim(taps, 2, cout_pad), 1, cin_pad)
    return taps.astype(jnp.bfloat16)


def _phase_split(x_nhwc, ksize, stride, pad):
    """Zero-pad spatially and (for stride>1) split into stride*stride phases
    stacked along H, so every conv tap becomes a contiguous static slice of
    the per-image slab inside the kernel."""
    xp = jnp.pad(x_nhwc, ((0, 0), (pad, pad), (pad, pad), (0, 0)))
    _, hp, wp, _ = xp.shape
    ho = (hp - ksize) // stride + 1
    wo = (wp - ksize) // stride + 1
    if stride == 1:
        return xp, hp, ho, wo
    hh = -(-hp // stride)
    wh = -(-wp // stride)
    phases = []
    for ph in range(stride):
        for pw in range(stride):
            sub = xp[:, ph::stride, pw::stride, :]
            sub = jnp.pad(sub, ((0, 0), (0, hh - sub.shape[1]),
                                (0, wh - sub.shape[2]), (0, 0)))
            phases.append(sub)
    return jnp.concatenate(phases, axis=1), hh, ho, wo


def _bn_scale_shift(sum_t, m2_t, count, gamma, beta):
    """Merge per-tile (sum, centered-M2) partials (parallel-variance formula)
    and fold training-mode BN (biased variance) into y = z*scale + shift."""
    ntiles = sum_t.shape[0]
    total = ntiles * count
    mean = jnp.sum(sum_t, axis=0) / total
    mu_t = sum_t / count
    m2 = jnp.sum(m2_t, axis=0) + count * jnp.sum((mu_t - mean[None, :]) ** 2, axis=0)
    var = m2 / total
    scale = gamma * jax.lax.rsqrt(var + EPS)
    shift = beta - mean * scale
    return scale, shift


def _aff_rows(rows, cpad):
    a = jnp.zeros((8, cpad), jnp.float32)
    for i, r in enumerate(rows):
        a = a.at[i, :].set(r)
    return a


def res_block_forward(x_nchw, params, in_channels, out_channels):
    conv_shortcut = in_channels != out_channels
    stride = 2 if conv_shortcut else 1
    ksize = 3

    # NCHW (PyTorch) -> NHWC, only at the module boundary.
    x = jnp.transpose(x_nchw, (0, 2, 3, 1)).astype(jnp.float32)
    n = x.shape[0]
    cin = in_channels
    cpad = _round_up(out_channels, LANES)

    # ---- conv1 pass 1 (+ fused 1x1 stride-2 shortcut conv) ------------------
    x_taps, hh, ho, wo = _phase_split(x.astype(jnp.bfloat16), ksize, stride, 1)
    count = ho * wo
    m_true = n * count
    w1 = _conv_w_to_taps(params["w1"], cin, cpad)            # (9, cin, cpad)

    x_spec = pl.BlockSpec((1,) + x_taps.shape[1:], lambda i: (i, 0, 0, 0))
    w1_spec = pl.BlockSpec(w1.shape, lambda i: (0, 0, 0))
    img_spec = pl.BlockSpec((1, ho, wo, cpad), lambda i: (i, 0, 0, 0))
    st_spec = pl.BlockSpec((1, 8, cpad), lambda i: (i, 0, 0))
    img_bf16 = jax.ShapeDtypeStruct((n, ho, wo, cpad), jnp.bfloat16)
    st_shape = jax.ShapeDtypeStruct((n, 8, cpad), jnp.float32)

    img_bytes_bf16 = _nbytes((n, ho, wo, cpad), jnp.bfloat16)
    st_bytes = _nbytes((n, 8, cpad), jnp.float32)

    if conv_shortcut:
        wsc = _pad_dim(jnp.transpose(params["wsc"][:, :, 0, 0]), 1, cpad)
        wsc = wsc.astype(jnp.bfloat16)                       # (cin, cpad)
        flops1 = 2 * m_true * (ksize * ksize + 1) * cin * cpad
        bytes1 = (x_taps.size * x_taps.dtype.itemsize
                  + w1.size * w1.dtype.itemsize + wsc.size * wsc.dtype.itemsize
                  + 2 * img_bytes_bf16 + st_bytes)
        z1, zsc, st1 = pl.pallas_call(
            functools.partial(_conv1_shortcut_kernel, ksize=ksize,
                              stride=stride, hh=hh, ho=ho, wo=wo),
            grid=(n,),
            in_specs=[x_spec, w1_spec,
                      pl.BlockSpec(wsc.shape, lambda i: (0, 0))],
            out_specs=(img_spec, img_spec, st_spec),
            out_shape=(img_bf16, img_bf16, st_shape),
            compiler_params=_MOSAIC_PARAMS,
            cost_estimate=pl.CostEstimate(flops=int(flops1), transcendentals=0,
                                          bytes_accessed=int(bytes1)),
        )(x_taps, w1, wsc)
    else:
        zsc = None
        flops1 = 2 * m_true * ksize * ksize * cin * cpad
        bytes1 = (x_taps.size * x_taps.dtype.itemsize
                  + w1.size * w1.dtype.itemsize + img_bytes_bf16 + st_bytes)
        z1, st1 = pl.pallas_call(
            functools.partial(_conv1_kernel, ksize=ksize, stride=stride,
                              hh=hh, ho=ho, wo=wo),
            grid=(n,),
            in_specs=[x_spec, w1_spec],
            out_specs=(img_spec, st_spec),
            out_shape=(img_bf16, st_shape),
            compiler_params=_MOSAIC_PARAMS,
            cost_estimate=pl.CostEstimate(flops=int(flops1), transcendentals=0,
                                          bytes_accessed=int(bytes1)),
        )(x_taps, w1)

    g1 = _pad_dim(params["g1"], 0, cpad)
    b1 = _pad_dim(params["b1"], 0, cpad)
    scale1, shift1 = _bn_scale_shift(st1[:, 0, :], st1[:, 1, :], count, g1, b1)
    aff1 = _aff_rows([scale1, shift1], cpad)

    # ---- conv2 pass 1: fused BN1-apply + ReLU + 3x3 conv + BN2 stats --------
    z1p = jnp.pad(z1, ((0, 0), (1, 1), (1, 1), (0, 0)))      # bf16 halo of zeros
    w2 = _conv_w_to_taps(params["w2"], cpad, cpad)           # (9, cpad, cpad)

    flops2 = 2 * m_true * 9 * cpad * cpad
    bytes2 = (z1p.size * z1p.dtype.itemsize + w2.size * w2.dtype.itemsize
              + 8 * cpad * 4 + img_bytes_bf16 + st_bytes)
    z2, st2 = pl.pallas_call(
        functools.partial(_conv2_kernel, ho=ho, wo=wo),
        grid=(n,),
        in_specs=[pl.BlockSpec((1, ho + 2, wo + 2, cpad), lambda i: (i, 0, 0, 0)),
                  pl.BlockSpec((8, cpad), lambda i: (0, 0)),
                  pl.BlockSpec(w2.shape, lambda i: (0, 0, 0))],
        out_specs=(img_spec, st_spec),
        out_shape=(img_bf16, st_shape),
        compiler_params=_MOSAIC_PARAMS,
        cost_estimate=pl.CostEstimate(flops=int(flops2), transcendentals=0,
                                      bytes_accessed=int(bytes2)),
    )(z1p, aff1, w2)

    g2 = _pad_dim(params["g2"], 0, cpad)
    b2 = _pad_dim(params["b2"], 0, cpad)
    scale2, shift2 = _bn_scale_shift(st2[:, 0, :], st2[:, 1, :], count, g2, b2)

    if conv_shortcut:
        gsc = _pad_dim(params["gsc"], 0, cpad)
        bsc = _pad_dim(params["bsc"], 0, cpad)
        scale_sc, shift_sc = _bn_scale_shift(st1[:, 2, :], st1[:, 3, :],
                                             count, gsc, bsc)
        aff2 = _aff_rows([scale2, shift2, scale_sc, shift_sc], cpad)
        residual = zsc                                       # (n, ho, wo, cpad) bf16
    else:
        aff2 = _aff_rows([scale2, shift2], cpad)
        residual = _pad_dim(x, 3, cpad).astype(jnp.bfloat16)  # identity shortcut

    # ---- pass 2: BN2-apply (+ BN_sc-apply) + residual add + final ReLU ------
    bytes3 = (2 * img_bytes_bf16 + 8 * cpad * 4
              + _nbytes((n, ho, wo, cpad), jnp.float32))
    out = pl.pallas_call(
        functools.partial(_bn_residual_relu_kernel, conv_shortcut=conv_shortcut),
        grid=(n,),
        in_specs=[img_spec, img_spec, pl.BlockSpec((8, cpad), lambda i: (0, 0))],
        out_specs=img_spec,
        out_shape=jax.ShapeDtypeStruct((n, ho, wo, cpad), jnp.float32),
        compiler_params=_MOSAIC_PARAMS,
        cost_estimate=pl.CostEstimate(flops=int(4 * m_true * cpad),
                                      transcendentals=0,
                                      bytes_accessed=int(bytes3)),
    )(z2, residual, aff2)

    out = out[:, :, :, :out_channels]
    return jnp.transpose(out, (0, 3, 1, 2))


# ---------------------------------------------------------------------------
# Params + pure-JAX reference (correctness sanity check).
# ---------------------------------------------------------------------------
def init_resblock_params(key, in_channels, out_channels):
    k1, k2, k3 = jax.random.split(key, 3)
    params = {
        "w1": 0.1 * jax.random.normal(k1, (out_channels, in_channels, 3, 3), jnp.float32),
        "w2": 0.1 * jax.random.normal(k2, (out_channels, out_channels, 3, 3), jnp.float32),
        "g1": jnp.ones((out_channels,), jnp.float32),
        "b1": jnp.zeros((out_channels,), jnp.float32),
        "g2": jnp.ones((out_channels,), jnp.float32),
        "b2": jnp.zeros((out_channels,), jnp.float32),
    }
    if in_channels != out_channels:
        params["wsc"] = 0.1 * jax.random.normal(
            k3, (out_channels, in_channels, 1, 1), jnp.float32)
        params["gsc"] = jnp.ones((out_channels,), jnp.float32)
        params["bsc"] = jnp.zeros((out_channels,), jnp.float32)
    return params


def reference_forward(x, params, in_channels, out_channels):
    def conv(x, w, stride, pad):
        return jax.lax.conv_general_dilated(
            x, w, window_strides=(stride, stride),
            padding=((pad, pad), (pad, pad)),
            dimension_numbers=("NCHW", "OIHW", "NCHW"))

    def bn(x, g, b):
        mean = jnp.mean(x, axis=(0, 2, 3), keepdims=True)
        var = jnp.mean((x - mean) ** 2, axis=(0, 2, 3), keepdims=True)
        return (g.reshape(1, -1, 1, 1) * (x - mean) * jax.lax.rsqrt(var + EPS)
                + b.reshape(1, -1, 1, 1))

    stride = 2 if in_channels != out_channels else 1
    h = jax.nn.relu(bn(conv(x, params["w1"], stride, 1), params["g1"], params["b1"]))
    h = bn(conv(h, params["w2"], 1, 1), params["g2"], params["b2"])
    if in_channels != out_channels:
        sc = bn(conv(x, params["wsc"], 2, 0), params["gsc"], params["bsc"])
    else:
        sc = x
    return jax.nn.relu(h + sc)


if __name__ == "__main__":
    key = jax.random.PRNGKey(0)
    kx, kp, kx2, kp2 = jax.random.split(key, 4)

    # Case 1: in != out -> strided 3x3 conv1 + fused 1x1-conv shortcut path.
    in_c, out_c = 4, 8
    x = jax.random.normal(kx, (2, in_c, 16, 16), jnp.float32)
    params = init_resblock_params(kp, in_c, out_c)
    fwd = jax.jit(functools.partial(res_block_forward,
                                    in_channels=in_c, out_channels=out_c))
    out = fwd(x, params)
    jax.block_until_ready(out)
    assert out.shape == (2, out_c, 8, 8), out.shape
    assert bool(jnp.all(out >= 0.0))                       # final ReLU
    ref = reference_forward(x, params, in_c, out_c)
    err = float(jnp.linalg.norm(out - ref) / (jnp.linalg.norm(ref) + 1e-6))
    assert err < 0.1, f"relative error too large: {err}"

    # Case 2: in == out -> identity-shortcut path.
    in_c2 = out_c2 = 8
    x2 = jax.random.normal(kx2, (2, in_c2, 16, 16), jnp.float32)
    params2 = init_resblock_params(kp2, in_c2, out_c2)
    fwd2 = jax.jit(functools.partial(res_block_forward,
                                     in_channels=in_c2, out_channels=out_c2))
    out2 = fwd2(x2, params2)
    jax.block_until_ready(out2)
    assert out2.shape == (2, out_c2, 16, 16), out2.shape
    ref2 = reference_forward(x2, params2, in_c2, out_c2)
    err2 = float(jnp.linalg.norm(out2 - ref2) / (jnp.linalg.norm(ref2) + 1e-6))
    assert err2 < 0.1, f"relative error too large: {err2}"

    print("KERNEL_OK")
</pallas_src>

<mosaic_0001>
module attributes {stable_mosaic.version = 11 : i64} {
  func.func @_conv1_shortcut_kernel(%arg0: i32, %arg1: memref<1x36x9x4xbf16, #tpu.memory_space<vmem>>, %arg2: memref<9x4x128xbf16, #tpu.memory_space<vmem>>, %arg3: memref<4x128xbf16, #tpu.memory_space<vmem>>, %arg4: memref<1x8x8x128xbf16, #tpu.memory_space<vmem>>, %arg5: memref<1x8x8x128xbf16, #tpu.memory_space<vmem>>, %arg6: memref<1x8x128xf32, #tpu.memory_space<vmem>>) attributes {dimension_semantics = [#tpu.dimension_semantics<parallel>], iteration_bounds = array<i64: 2>, scalar_prefetch = 0 : i64, scratch_operands = 0 : i64, tpu.core_type = #tpu.core_type<tc>, window_params = [{transform_indices = @transform_0, window_bounds = array<i64: 1, 36, 9, 4>}, {pipeline_mode = #tpu.pipeline_mode<synchronous>, transform_indices = @transform_1, window_bounds = array<i64: 9, 4, 128>}, {pipeline_mode = #tpu.pipeline_mode<synchronous>, transform_indices = @transform_2, window_bounds = array<i64: 4, 128>}, {transform_indices = @transform_3, window_bounds = array<i64: 1, 8, 8, 128>}, {transform_indices = @transform_4, window_bounds = array<i64: 1, 8, 8, 128>}, {transform_indices = @transform_5, window_bounds = array<i64: 1, 8, 128>}]} {
    %c0 = arith.constant 0 : index
    %c0_0 = arith.constant 0 : index
    %c0_1 = arith.constant 0 : index
    %c0_2 = arith.constant 0 : index
    %0 = vector.load %arg1[%c0, %c0_0, %c0_1, %c0_2] : memref<1x36x9x4xbf16, #tpu.memory_space<vmem>>, vector<1x36x9x4xbf16>
    %1 = vector.shape_cast %0 : vector<1x36x9x4xbf16> to vector<36x9x4xbf16>
    %2 = arith.extf %1 : vector<36x9x4xbf16> to vector<36x9x4xf32>
    %cst = arith.constant 0.000000e+00 : f32
    %3 = vector.broadcast %cst : f32 to vector<64x128xf32>
    %4 = vector.extract_strided_slice %2 {offsets = [0, 0, 0], sizes = [8, 8, 4], strides = [1, 1, 1]} : vector<36x9x4xf32> to vector<8x8x4xf32>
    %5 = vector.shape_cast %4 : vector<8x8x4xf32> to vector<64x4xf32>
    %6 = arith.truncf %5 : vector<64x4xf32> to vector<64x4xbf16>
    %c0_3 = arith.constant 0 : index
    %c0_4 = arith.constant 0 : index
    %c0_5 = arith.constant 0 : index
    %7 = vector.load %arg2[%c0_3, %c0_4, %c0_5] : memref<9x4x128xbf16, #tpu.memory_space<vmem>>, vector<1x4x128xbf16>
    %8 = vector.shape_cast %7 : vector<1x4x128xbf16> to vector<4x128xbf16>
    %cst_6 = arith.constant dense<0.000000e+00> : vector<64x128xf32>
    %9 = tpu.matmul %6, %8, %cst_6 {dimension_numbers = #tpu.dot_dimension_numbers<[1], [0], [0], [1], [0, 0, 1, 1], [], []>} : vector<64x4xbf16>, vector<4x128xbf16>, vector<64x128xf32> -> vector<64x128xf32>
    %10 = arith.addf %3, %9 : vector<64x128xf32>
    %11 = vector.extract_strided_slice %2 {offsets = [9, 0, 0], sizes = [8, 8, 4], strides = [1, 1, 1]} : vector<36x9x4xf32> to vector<8x8x4xf32>
    %12 = vector.shape_cast %11 : vector<8x8x4xf32> to vector<64x4xf32>
    %13 = arith.truncf %12 : vector<64x4xf32> to vector<64x4xbf16>
    %c1 = arith.constant 1 : index
    %c0_7 = arith.constant 0 : index
    %c0_8 = arith.constant 0 : index
    %14 = vector.load %arg2[%c1, %c0_7, %c0_8] : memref<9x4x128xbf16, #tpu.memory_space<vmem>>, vector<1x4x128xbf16>
    %15 = vector.shape_cast %14 : vector<1x4x128xbf16> to vector<4x128xbf16>
    %cst_9 = arith.constant dense<0.000000e+00> : vector<64x128xf32>
    %16 = tpu.matmul %13, %15, %cst_9 {dimension_numbers = #tpu.dot_dimension_numbers<[1], [0], [0], [1], [0, 0, 1, 1], [], []>} : vector<64x4xbf16>, vector<4x128xbf16>, vector<64x128xf32> -> vector<64x128xf32>
    %17 = arith.addf %10, %16 : vector<64x128xf32>
    %18 = vector.extract_strided_slice %2 {offsets = [0, 1, 0], sizes = [8, 8, 4], strides = [1, 1, 1]} : vector<36x9x4xf32> to vector<8x8x4xf32>
    %19 = vector.shape_cast %18 : vector<8x8x4xf32> to vector<64x4xf32>
    %20 = arith.truncf %19 : vector<64x4xf32> to vector<64x4xbf16>
    %c2 = arith.constant 2 : index
    %c0_10 = arith.constant 0 : index
    %c0_11 = arith.constant 0 : index
    %21 = vector.load %arg2[%c2, %c0_10, %c0_11] : memref<9x4x128xbf16, #tpu.memory_space<vmem>>, vector<1x4x128xbf16>
    %22 = vector.shape_cast %21 : vector<1x4x128xbf16> to vector<4x128xbf16>
    %cst_12 = arith.constant dense<0.000000e+00> : vector<64x128xf32>
    %23 = tpu.matmul %20, %22, %cst_12 {dimension_numbers = #tpu.dot_dimension_numbers<[1], [0], [0], [1], [0, 0, 1, 1], [], []>} : vector<64x4xbf16>, vector<4x128xbf16>, vector<64x128xf32> -> vector<64x128xf32>
    %24 = arith.addf %17, %23 : vector<64x128xf32>
    %25 = vector.extract_strided_slice %2 {offsets = [18, 0, 0], sizes = [8, 8, 4], strides = [1, 1, 1]} : vector<36x9x4xf32> to vector<8x8x4xf32>
    %26 = vector.shape_cast %25 : vector<8x8x4xf32> to vector<64x4xf32>
    %27 = arith.truncf %26 : vector<64x4xf32> to vector<64x4xbf16>
    %c3 = arith.constant 3 : index
    %c0_13 = arith.constant 0 : index
    %c0_14 = arith.constant 0 : index
    %28 = vector.load %arg2[%c3, %c0_13, %c0_14] : memref<9x4x128xbf16, #tpu.memory_space<vmem>>, vector<1x4x128xbf16>
    %29 = vector.shape_cast %28 : vector<1x4x128xbf16> to vector<4x128xbf16>
    %cst_15 = arith.constant dense<0.000000e+00> : vector<64x128xf32>
    %30 = tpu.matmul %27, %29, %cst_15 {dimension_numbers = #tpu.dot_dimension_numbers<[1], [0], [0], [1], [0, 0, 1, 1], [], []>} : vector<64x4xbf16>, vector<4x128xbf16>, vector<64x128xf32> -> vector<64x128xf32>
    %31 = arith.addf %24, %30 : vector<64x128xf32>
    %32 = vector.extract_strided_slice %2 {offsets = [27, 0, 0], sizes = [8, 8, 4], strides = [1, 1, 1]} : vector<36x9x4xf32> to vector<8x8x4xf32>
    %33 = vector.shape_cast %32 : vector<8x8x4xf32> to vector<64x4xf32>
    %34 = arith.truncf %33 : vector<64x4xf32> to vector<64x4xbf16>
    %c4 = arith.constant 4 : index
    %c0_16 = arith.constant 0 : index
    %c0_17 = arith.constant 0 : index
    %35 = vector.load %arg2[%c4, %c0_16, %c0_17] : memref<9x4x128xbf16, #tpu.memory_space<vmem>>, vector<1x4x128xbf16>
    %36 = vector.shape_cast %35 : vector<1x4x128xbf16> to vector<4x128xbf16>
    %cst_18 = arith.constant dense<0.000000e+00> : vector<64x128xf32>
    %37 = tpu.matmul %34, %36, %cst_18 {dimension_numbers = #tpu.dot_dimension_numbers<[1], [0], [0], [1], [0, 0, 1, 1], [], []>} : vector<64x4xbf16>, vector<4x128xbf16>, vector<64x128xf32> -> vector<64x128xf32>
    %38 = arith.addf %31, %37 : vector<64x128xf32>
    %39 = vector.extract_strided_slice %2 {offsets = [18, 1, 0], sizes = [8, 8, 4], strides = [1, 1, 1]} : vector<36x9x4xf32> to vector<8x8x4xf32>
    %40 = vector.shape_cast %39 : vector<8x8x4xf32> to vector<64x4xf32>
    %41 = arith.truncf %40 : vector<64x4xf32> to vector<64x4xbf16>
    %c5 = arith.constant 5 : index
    %c0_19 = arith.constant 0 : index
    %c0_20 = arith.constant 0 : index
    %42 = vector.load %arg2[%c5, %c0_19, %c0_20] : memref<9x4x128xbf16, #tpu.memory_space<vmem>>, vector<1x4x128xbf16>
    %43 = vector.shape_cast %42 : vector<1x4x128xbf16> to vector<4x128xbf16>
    %cst_21 = arith.constant dense<0.000000e+00> : vector<64x128xf32>
    %44 = tpu.matmul %41, %43, %cst_21 {dimension_numbers = #tpu.dot_dimension_numbers<[1], [0], [0], [1], [0, 0, 1, 1], [], []>} : vector<64x4xbf16>, vector<4x128xbf16>, vector<64x128xf32> -> vector<64x128xf32>
    %45 = arith.addf %38, %44 : vector<64x128xf32>
    %46 = vector.extract_strided_slice %2 {offsets = [1, 0, 0], sizes = [8, 8, 4], strides = [1, 1, 1]} : vector<36x9x4xf32> to vector<8x8x4xf32>
    %47 = vector.shape_cast %46 : vector<8x8x4xf32> to vector<64x4xf32>
    %48 = arith.truncf %47 : vector<64x4xf32> to vector<64x4xbf16>
    %c6 = arith.constant 6 : index
    %c0_22 = arith.constant 0 : index
    %c0_23 = arith.constant 0 : index
    %49 = vector.load %arg2[%c6, %c0_22, %c0_23] : memref<9x4x128xbf16, #tpu.memory_space<vmem>>, vector<1x4x128xbf16>
    %50 = vector.shape_cast %49 : vector<1x4x128xbf16> to vector<4x128xbf16>
    %cst_24 = arith.constant dense<0.000000e+00> : vector<64x128xf32>
    %51 = tpu.matmul %48, %50, %cst_24 {dimension_numbers = #tpu.dot_dimension_numbers<[1], [0], [0], [1], [0, 0, 1, 1], [], []>} : vector<64x4xbf16>, vector<4x128xbf16>, vector<64x128xf32> -> vector<64x128xf32>
    %52 = arith.addf %45, %51 : vector<64x128xf32>
    %53 = vector.extract_strided_slice %2 {offsets = [10, 0, 0], sizes = [8, 8, 4], strides = [1, 1, 1]} : vector<36x9x4xf32> to vector<8x8x4xf32>
    %54 = vector.shape_cast %53 : vector<8x8x4xf32> to vector<64x4xf32>
    %55 = arith.truncf %54 : vector<64x4xf32> to vector<64x4xbf16>
    %c7 = arith.constant 7 : index
    %c0_25 = arith.constant 0 : index
    %c0_26 = arith.constant 0 : index
    %56 = vector.load %arg2[%c7, %c0_25, %c0_26] : memref<9x4x128xbf16, #tpu.memory_space<vmem>>, vector<1x4x128xbf16>
    %57 = vector.shape_cast %56 : vector<1x4x128xbf16> to vector<4x128xbf16>
    %cst_27 = arith.constant dense<0.000000e+00> : vector<64x128xf32>
    %58 = tpu.matmul %55, %57, %cst_27 {dimension_numbers = #tpu.dot_dimension_numbers<[1], [0], [0], [1], [0, 0, 1, 1], [], []>} : vector<64x4xbf16>, vector<4x128xbf16>, vector<64x128xf32> -> vector<64x128xf32>
    %59 = arith.addf %52, %58 : vector<64x128xf32>
    %60 = vector.extract_strided_slice %2 {offsets = [1, 1, 0], sizes = [8, 8, 4], strides = [1, 1, 1]} : vector<36x9x4xf32> to vector<8x8x4xf32>
    %61 = vector.shape_cast %60 : vector<8x8x4xf32> to vector<64x4xf32>
    %62 = arith.truncf %61 : vector<64x4xf32> to vector<64x4xbf16>
    %c8 = arith.constant 8 : index
    %c0_28 = arith.constant 0 : index
    %c0_29 = arith.constant 0 : index
    %63 = vector.load %arg2[%c8, %c0_28, %c0_29] : memref<9x4x128xbf16, #tpu.memory_space<vmem>>, vector<1x4x128xbf16>
    %64 = vector.shape_cast %63 : vector<1x4x128xbf16> to vector<4x128xbf16>
    %cst_30 = arith.constant dense<0.000000e+00> : vector<64x128xf32>
    %65 = tpu.matmul %62, %64, %cst_30 {dimension_numbers = #tpu.dot_dimension_numbers<[1], [0], [0], [1], [0, 0, 1, 1], [], []>} : vector<64x4xbf16>, vector<4x128xbf16>, vector<64x128xf32> -> vector<64x128xf32>
    %66 = arith.addf %59, %65 : vector<64x128xf32>
    %67 = vector.extract_strided_slice %2 {offsets = [27, 0, 0], sizes = [8, 8, 4], strides = [1, 1, 1]} : vector<36x9x4xf32> to vector<8x8x4xf32>
    %68 = vector.shape_cast %67 : vector<8x8x4xf32> to vector<64x4xf32>
    %69 = arith.truncf %68 : vector<64x4xf32> to vector<64x4xbf16>
    %c0_31 = arith.constant 0 : index
    %c0_32 = arith.constant 0 : index
    %70 = vector.load %arg3[%c0_31, %c0_32] : memref<4x128xbf16, #tpu.memory_space<vmem>>, vector<4x128xbf16>
    %cst_33 = arith.constant dense<0.000000e+00> : vector<64x128xf32>
    %71 = tpu.matmul %69, %70, %cst_33 {dimension_numbers = #tpu.dot_dimension_numbers<[1], [0], [0], [1], [0, 0, 1, 1], [], []>} : vector<64x4xbf16>, vector<4x128xbf16>, vector<64x128xf32> -> vector<64x128xf32>
    %cst_34 = arith.constant 0.000000e+00 : f32
    %72 = vector.broadcast %cst_34 : f32 to vector<1x8x128xf32>
    %c0_35 = arith.constant 0 : index
    %c0_36 = arith.constant 0 : index
    %c0_37 = arith.constant 0 : index
    %73 = vector.load %arg6[%c0_35, %c0_36, %c0_37] : memref<1x8x128xf32, #tpu.memory_space<vmem>>, vector<1x8x128xf32>
    tpu.vector_store %arg6[%c0_35, %c0_36, %c0_37], %72 {strides = array<i32>} : memref<1x8x128xf32, #tpu.memory_space<vmem>>, vector<1x8x128xf32>,
    %cst_38 = arith.constant dense<0.000000e+00> : vector<128xf32>
    %74 = vector.multi_reduction <add>, %66, %cst_38 [0] : vector<64x128xf32> to vector<128xf32>
    %75 = vector.shape_cast %74 : vector<128xf32> to vector<1x128xf32>
    %cst_39 = arith.constant 1.562500e-02 : f32
    %76 = vector.broadcast %cst_39 : f32 to vector<1x128xf32>
    %77 = arith.mulf %75, %76 : vector<1x128xf32>
    %78 = vector.broadcast %77 : vector<1x128xf32> to vector<64x128xf32>
    %79 = arith.subf %66, %78 : vector<64x128xf32>
    %80 = arith.mulf %79, %79 : vector<64x128xf32>
    %cst_40 = arith.constant dense<0.000000e+00> : vector<128xf32>
    %81 = vector.multi_reduction <add>, %80, %cst_40 [0] : vector<64x128xf32> to vector<128xf32>
    %82 = vector.shape_cast %81 : vector<128xf32> to vector<1x128xf32>
    %c0_41 = arith.constant 0 : index
    %c0_42 = arith.constant 0 : index
    %c0_43 = arith.constant 0 : index
    %83 = vector.load %arg6[%c0_41, %c0_42, %c0_43] : memref<1x8x128xf32, #tpu.memory_space<vmem>>, vector<1x1x128xf32>
    %84 = vector.shape_cast %83 : vector<1x1x128xf32> to vector<1x128xf32>
    %85 = vector.shape_cast %75 : vector<1x128xf32> to vector<1x1x128xf32>
    tpu.vector_store %arg6[%c0_41, %c0_42, %c0_43], %85 {strides = array<i32>} : memref<1x8x128xf32, #tpu.memory_space<vmem>>, vector<1x1x128xf32>,
    %c0_44 = arith.constant 0 : index
    %c1_45 = arith.constant 1 : index
    %c0_46 = arith.constant 0 : index
    %86 = vector.load %arg6[%c0_44, %c1_45, %c0_46] : memref<1x8x128xf32, #tpu.memory_space<vmem>>, vector<1x1x128xf32>
    %87 = vector.shape_cast %86 : vector<1x1x128xf32> to vector<1x128xf32>
    %88 = vector.shape_cast %82 : vector<1x128xf32> to vector<1x1x128xf32>
    tpu.vector_store %arg6[%c0_44, %c1_45, %c0_46], %88 {strides = array<i32>} : memref<1x8x128xf32, #tpu.memory_space<vmem>>, vector<1x1x128xf32>,
    %cst_47 = arith.constant dense<0.000000e+00> : vector<128xf32>
    %89 = vector.multi_reduction <add>, %71, %cst_47 [0] : vector<64x128xf32> to vector<128xf32>
    %90 = vector.shape_cast %89 : vector<128xf32> to vector<1x128xf32>
    %cst_48 = arith.constant 1.562500e-02 : f32
    %91 = vector.broadcast %cst_48 : f32 to vector<1x128xf32>
    %92 = arith.mulf %90, %91 : vector<1x128xf32>
    %93 = vector.broadcast %92 : vector<1x128xf32> to vector<64x128xf32>
    %94 = arith.subf %71, %93 : vector<64x128xf32>
    %95 = arith.mulf %94, %94 : vector<64x128xf32>
    %cst_49 = arith.constant dense<0.000000e+00> : vector<128xf32>
    %96 = vector.multi_reduction <add>, %95, %cst_49 [0] : vector<64x128xf32> to vector<128xf32>
    %97 = vector.shape_cast %96 : vector<128xf32> to vector<1x128xf32>
    %c0_50 = arith.constant 0 : index
    %c2_51 = arith.constant 2 : index
    %c0_52 = arith.constant 0 : index
    %98 = vector.load %arg6[%c0_50, %c2_51, %c0_52] : memref<1x8x128xf32, #tpu.memory_space<vmem>>, vector<1x1x128xf32>
    %99 = vector.shape_cast %98 : vector<1x1x128xf32> to vector<1x128xf32>
    %100 = vector.shape_cast %90 : vector<1x128xf32> to vector<1x1x128xf32>
    tpu.vector_store %arg6[%c0_50, %c2_51, %c0_52], %100 {strides = array<i32>} : memref<1x8x128xf32, #tpu.memory_space<vmem>>, vector<1x1x128xf32>,
    %c0_53 = arith.constant 0 : index
    %c3_54 = arith.constant 3 : index
    %c0_55 = arith.constant 0 : index
    %101 = vector.load %arg6[%c0_53, %c3_54, %c0_55] : memref<1x8x128xf32, #tpu.memory_space<vmem>>, vector<1x1x128xf32>
    %102 = vector.shape_cast %101 : vector<1x1x128xf32> to vector<1x128xf32>
    %103 = vector.shape_cast %97 : vector<1x128xf32> to vector<1x1x128xf32>
    tpu.vector_store %arg6[%c0_53, %c3_54, %c0_55], %103 {strides = array<i32>} : memref<1x8x128xf32, #tpu.memory_space<vmem>>, vector<1x1x128xf32>,
    %104 = vector.shape_cast %66 : vector<64x128xf32> to vector<8x8x128xf32>
    %105 = arith.truncf %104 : vector<8x8x128xf32> to vector<8x8x128xbf16>
    %c0_56 = arith.constant 0 : index
    %c0_57 = arith.constant 0 : index
    %c0_58 = arith.constant 0 : index
    %c0_59 = arith.constant 0 : index
    %106 = vector.load %arg4[%c0_56, %c0_57, %c0_58, %c0_59] : memref<1x8x8x128xbf16, #tpu.memory_space<vmem>>, vector<1x8x8x128xbf16>
    %107 = vector.shape_cast %106 : vector<1x8x8x128xbf16> to vector<8x8x128xbf16>
    %108 = vector.shape_cast %105 : vector<8x8x128xbf16> to vector<1x8x8x128xbf16>
    tpu.vector_store %arg4[%c0_56, %c0_57, %c0_58, %c0_59], %108 {strides = array<i32>} : memref<1x8x8x128xbf16, #tpu.memory_space<vmem>>, vector<1x8x8x128xbf16>,
    %109 = vector.shape_cast %71 : vector<64x128xf32> to vector<8x8x128xf32>
    %110 = arith.truncf %109 : vector<8x8x128xf32> to vector<8x8x128xbf16>
    %c0_60 = arith.constant 0 : index
    %c0_61 = arith.constant 0 : index
    %c0_62 = arith.constant 0 : index
    %c0_63 = arith.constant 0 : index
    %111 = vector.load %arg5[%c0_60, %c0_61, %c0_62, %c0_63] : memref<1x8x8x128xbf16, #tpu.memory_space<vmem>>, vector<1x8x8x128xbf16>
    %112 = vector.shape_cast %111 : vector<1x8x8x128xbf16> to vector<8x8x128xbf16>
    %113 = vector.shape_cast %110 : vector<8x8x128xbf16> to vector<1x8x8x128xbf16>
    tpu.vector_store %arg5[%c0_60, %c0_61, %c0_62, %c0_63], %113 {strides = array<i32>} : memref<1x8x8x128xbf16, #tpu.memory_space<vmem>>, vector<1x8x8x128xbf16>,
    return
  }
  func.func @transform_0(%arg0: i32) -> (i32, i32, i32, i32) {
    %c0_i32 = arith.constant 0 : i32
    %c0_i32_0 = arith.constant 0 : i32
    %c0_i32_1 = arith.constant 0 : i32
    %c0_i32_2 = arith.constant 0 : i32
    return %arg0, %c0_i32, %c0_i32_0, %c0_i32_1 : i32, i32, i32, i32
  }
  func.func @transform_1(%arg0: i32) -> (i32, i32, i32) {
    %c0_i32 = arith.constant 0 : i32
    %c0_i32_0 = arith.constant 0 : i32
    %c0_i32_1 = arith.constant 0 : i32
    %c0_i32_2 = arith.constant 0 : i32
    return %c0_i32, %c0_i32_0, %c0_i32_1 : i32, i32, i32
  }
  func.func @transform_2(%arg0: i32) -> (i32, i32) {
    %c0_i32 = arith.constant 0 : i32
    %c0_i32_0 = arith.constant 0 : i32
    %c0_i32_1 = arith.constant 0 : i32
    return %c0_i32, %c0_i32_0 : i32, i32
  }
  func.func @transform_3(%arg0: i32) -> (i32, i32, i32, i32) {
    %c0_i32 = arith.constant 0 : i32
    %c0_i32_0 = arith.constant 0 : i32
    %c0_i32_1 = arith.constant 0 : i32
    %c0_i32_2 = arith.constant 0 : i32
    return %arg0, %c0_i32, %c0_i32_0, %c0_i32_1 : i32, i32, i32, i32
  }
  func.func @transform_4(%arg0: i32) -> (i32, i32, i32, i32) {
    %c0_i32 = arith.constant 0 : i32
    %c0_i32_0 = arith.constant 0 : i32
    %c0_i32_1 = arith.constant 0 : i32
    %c0_i32_2 = arith.constant 0 : i32
    return %arg0, %c0_i32, %c0_i32_0, %c0_i32_1 : i32, i32, i32, i32
  }
  func.func @transform_5(%arg0: i32) -> (i32, i32, i32) {
    %c0_i32 = arith.constant 0 : i32
    %c0_i32_0 = arith.constant 0 : i32
    %c0_i32_1 = arith.constant 0 : i32
    return %arg0, %c0_i32, %c0_i32_0 : i32, i32, i32
  }
}

module attributes {stable_mosaic.version = 11 : i64} {
  func.func @_conv2_kernel(%arg0: i32, %arg1: memref<1x10x10x128xbf16, #tpu.memory_space<vmem>>, %arg2: memref<8x128xf32, #tpu.memory_space<vmem>>, %arg3: memref<9x128x128xbf16, #tpu.memory_space<vmem>>, %arg4: memref<1x8x8x128xbf16, #tpu.memory_space<vmem>>, %arg5: memref<1x8x128xf32, #tpu.memory_space<vmem>>) attributes {dimension_semantics = [#tpu.dimension_semantics<parallel>], iteration_bounds = array<i64: 2>, scalar_prefetch = 0 : i64, scratch_operands = 0 : i64, tpu.core_type = #tpu.core_type<tc>, window_params = [{transform_indices = @transform_0, window_bounds = array<i64: 1, 10, 10, 128>}, {pipeline_mode = #tpu.pipeline_mode<synchronous>, transform_indices = @transform_1, window_bounds = array<i64: 8, 128>}, {pipeline_mode = #tpu.pipeline_mode<synchronous>, transform_indices = @transform_2, window_bounds = array<i64: 9, 128, 128>}, {transform_indices = @transform_3, window_bounds = array<i64: 1, 8, 8, 128>}, {transform_indices = @transform_4, window_bounds = array<i64: 1, 8, 128>}]} {
    %c0 = arith.constant 0 : index
    %c0_0 = arith.constant 0 : index
    %0 = vector.load %arg2[%c0, %c0_0] : memref<8x128xf32, #tpu.memory_space<vmem>>, vector<8x128xf32>
    %c0_1 = arith.constant 0 : index
    %c0_2 = arith.constant 0 : index
    %c0_3 = arith.constant 0 : index
    %c0_4 = arith.constant 0 : index
    %1 = vector.load %arg1[%c0_1, %c0_2, %c0_3, %c0_4] : memref<1x10x10x128xbf16, #tpu.memory_space<vmem>>, vector<1x10x10x128xbf16>
    %2 = vector.shape_cast %1 : vector<1x10x10x128xbf16> to vector<10x10x128xbf16>
    %3 = arith.extf %2 : vector<10x10x128xbf16> to vector<10x10x128xf32>
    %4 = vector.extract_strided_slice %0 {offsets = [0, 0], sizes = [1, 128], strides = [1, 1]} : vector<8x128xf32> to vector<1x128xf32>
    %5 = vector.shape_cast %4 : vector<1x128xf32> to vector<1x1x128xf32>
    %6 = vector.broadcast %5 : vector<1x1x128xf32> to vector<10x10x128xf32>
    %7 = arith.mulf %3, %6 : vector<10x10x128xf32>
    %8 = vector.extract_strided_slice %0 {offsets = [1, 0], sizes = [1, 128], strides = [1, 1]} : vector<8x128xf32> to vector<1x128xf32>
    %9 = vector.shape_cast %8 : vector<1x128xf32> to vector<1x1x128xf32>
    %10 = vector.broadcast %9 : vector<1x1x128xf32> to vector<10x10x128xf32>
    %11 = arith.addf %7, %10 : vector<10x10x128xf32>
    %cst = arith.constant 0.000000e+00 : f32
    %12 = vector.broadcast %cst : f32 to vector<10x10x128xf32>
    %13 = arith.maximumf %11, %12 : vector<10x10x128xf32>
    %14 = tpu.iota {dimensions = array<i32: 1>} : vector<1x10x128xi32>
    %c1_i32 = arith.constant 1 : i32
    %15 = vector.broadcast %c1_i32 : i32 to vector<1x10x128xi32>
    %16 = arith.cmpi sge, %14, %15 : vector<1x10x128xi32>
    %c8_i32 = arith.constant 8 : i32
    %17 = vector.broadcast %c8_i32 : i32 to vector<1x10x128xi32>
    %18 = arith.cmpi sle, %14, %17 : vector<1x10x128xi32>
    %19 = arith.andi %16, %18 : vector<1x10x128xi1>
    %cst_5 = arith.constant 0.000000e+00 : f32
    %20 = vector.shape_cast %19 : vector<1x10x128xi1> to vector<1x10x128xi1>
    %21 = vector.broadcast %20 : vector<1x10x128xi1> to vector<10x10x128xi1>
    %22 = vector.broadcast %cst_5 : f32 to vector<10x10x128xf32>
    %23 = arith.select %21, %13, %22 : vector<10x10x128xi1>, vector<10x10x128xf32>
    %cst_6 = arith.constant 0.000000e+00 : f32
    %24 = vector.broadcast %cst_6 : f32 to vector<1x10x128xf32>
    %25 = vector.extract_strided_slice %23 {offsets = [1, 0, 0], sizes = [8, 10, 128], strides = [1, 1, 1]} : vector<10x10x128xf32> to vector<8x10x128xf32>
    %26 = tpu.concatenate %24, %25, %24 in 0 : vector<1x10x128xf32>, vector<8x10x128xf32>, vector<1x10x128xf32> -> vector<10x10x128xf32>
    %cst_7 = arith.constant 0.000000e+00 : f32
    %27 = vector.broadcast %cst_7 : f32 to vector<64x128xf32>
    %28 = vector.extract_strided_slice %26 {offsets = [0, 0, 0], sizes = [8, 8, 128], strides = [1, 1, 1]} : vector<10x10x128xf32> to vector<8x8x128xf32>
    %29 = vector.shape_cast %28 : vector<8x8x128xf32> to vector<64x128xf32>
    %30 = arith.truncf %29 : vector<64x128xf32> to vector<64x128xbf16>
    %c0_8 = arith.constant 0 : index
    %c0_9 = arith.constant 0 : index
    %c0_10 = arith.constant 0 : index
    %31 = vector.load %arg3[%c0_8, %c0_9, %c0_10] : memref<9x128x128xbf16, #tpu.memory_space<vmem>>, vector<1x128x128xbf16>
    %32 = vector.shape_cast %31 : vector<1x128x128xbf16> to vector<128x128xbf16>
    %cst_11 = arith.constant dense<0.000000e+00> : vector<64x128xf32>
    %33 = tpu.matmul %30, %32, %cst_11 {dimension_numbers = #tpu.dot_dimension_numbers<[1], [0], [0], [1], [0, 0, 1, 1], [], []>} : vector<64x128xbf16>, vector<128x128xbf16>, vector<64x128xf32> -> vector<64x128xf32>
    %34 = arith.addf %27, %33 : vector<64x128xf32>
    %35 = vector.extract_strided_slice %26 {offsets = [0, 1, 0], sizes = [8, 8, 128], strides = [1, 1, 1]} : vector<10x10x128xf32> to vector<8x8x128xf32>
    %36 = vector.shape_cast %35 : vector<8x8x128xf32> to vector<64x128xf32>
    %37 = arith.truncf %36 : vector<64x128xf32> to vector<64x128xbf16>
    %c1 = arith.constant 1 : index
    %c0_12 = arith.constant 0 : index
    %c0_13 = arith.constant 0 : index
    %38 = vector.load %arg3[%c1, %c0_12, %c0_13] : memref<9x128x128xbf16, #tpu.memory_space<vmem>>, vector<1x128x128xbf16>
    %39 = vector.shape_cast %38 : vector<1x128x128xbf16> to vector<128x128xbf16>
    %cst_14 = arith.constant dense<0.000000e+00> : vector<64x128xf32>
    %40 = tpu.matmul %37, %39, %cst_14 {dimension_numbers = #tpu.dot_dimension_numbers<[1], [0], [0], [1], [0, 0, 1, 1], [], []>} : vector<64x128xbf16>, vector<128x128xbf16>, vector<64x128xf32> -> vector<64x128xf32>
    %41 = arith.addf %34, %40 : vector<64x128xf32>
    %42 = vector.extract_strided_slice %26 {offsets = [0, 2, 0], sizes = [8, 8, 128], strides = [1, 1, 1]} : vector<10x10x128xf32> to vector<8x8x128xf32>
    %43 = vector.shape_cast %42 : vector<8x8x128xf32> to vector<64x128xf32>
    %44 = arith.truncf %43 : vector<64x128xf32> to vector<64x128xbf16>
    %c2 = arith.constant 2 : index
    %c0_15 = arith.constant 0 : index
    %c0_16 = arith.constant 0 : index
    %45 = vector.load %arg3[%c2, %c0_15, %c0_16] : memref<9x128x128xbf16, #tpu.memory_space<vmem>>, vector<1x128x128xbf16>
    %46 = vector.shape_cast %45 : vector<1x128x128xbf16> to vector<128x128xbf16>
    %cst_17 = arith.constant dense<0.000000e+00> : vector<64x128xf32>
    %47 = tpu.matmul %44, %46, %cst_17 {dimension_numbers = #tpu.dot_dimension_numbers<[1], [0], [0], [1], [0, 0, 1, 1], [], []>} : vector<64x128xbf16>, vector<128x128xbf16>, vector<64x128xf32> -> vector<64x128xf32>
    %48 = arith.addf %41, %47 : vector<64x128xf32>
    %49 = vector.extract_strided_slice %26 {offsets = [1, 0, 0], sizes = [8, 8, 128], strides = [1, 1, 1]} : vector<10x10x128xf32> to vector<8x8x128xf32>
    %50 = vector.shape_cast %49 : vector<8x8x128xf32> to vector<64x128xf32>
    %51 = arith.truncf %50 : vector<64x128xf32> to vector<64x128xbf16>
    %c3 = arith.constant 3 : index
    %c0_18 = arith.constant 0 : index
    %c0_19 = arith.constant 0 : index
    %52 = vector.load %arg3[%c3, %c0_18, %c0_19] : memref<9x128x128xbf16, #tpu.memory_space<vmem>>, vector<1x128x128xbf16>
    %53 = vector.shape_cast %52 : vector<1x128x128xbf16> to vector<128x128xbf16>
    %cst_20 = arith.constant dense<0.000000e+00> : vector<64x128xf32>
    %54 = tpu.matmul %51, %53, %cst_20 {dimension_numbers = #tpu.dot_dimension_numbers<[1], [0], [0], [1], [0, 0, 1, 1], [], []>} : vector<64x128xbf16>, vector<128x128xbf16>, vector<64x128xf32> -> vector<64x128xf32>
    %55 = arith.addf %48, %54 : vector<64x128xf32>
    %56 = vector.extract_strided_slice %26 {offsets = [1, 1, 0], sizes = [8, 8, 128], strides = [1, 1, 1]} : vector<10x10x128xf32> to vector<8x8x128xf32>
    %57 = vector.shape_cast %56 : vector<8x8x128xf32> to vector<64x128xf32>
    %58 = arith.truncf %57 : vector<64x128xf32> to vector<64x128xbf16>
    %c4 = arith.constant 4 : index
    %c0_21 = arith.constant 0 : index
    %c0_22 = arith.constant 0 : index
    %59 = vector.load %arg3[%c4, %c0_21, %c0_22] : memref<9x128x128xbf16, #tpu.memory_space<vmem>>, vector<1x128x128xbf16>
    %60 = vector.shape_cast %59 : vector<1x128x128xbf16> to vector<128x128xbf16>
    %cst_23 = arith.constant dense<0.000000e+00> : vector<64x128xf32>
    %61 = tpu.matmul %58, %60, %cst_23 {dimension_numbers = #tpu.dot_dimension_numbers<[1], [0], [0], [1], [0, 0, 1, 1], [], []>} : vector<64x128xbf16>, vector<128x128xbf16>, vector<64x128xf32> -> vector<64x128xf32>
    %62 = arith.addf %55, %61 : vector<64x128xf32>
    %63 = vector.extract_strided_slice %26 {offsets = [1, 2, 0], sizes = [8, 8, 128], strides = [1, 1, 1]} : vector<10x10x128xf32> to vector<8x8x128xf32>
    %64 = vector.shape_cast %63 : vector<8x8x128xf32> to vector<64x128xf32>
    %65 = arith.truncf %64 : vector<64x128xf32> to vector<64x128xbf16>
    %c5 = arith.constant 5 : index
    %c0_24 = arith.constant 0 : index
    %c0_25 = arith.constant 0 : index
    %66 = vector.load %arg3[%c5, %c0_24, %c0_25] : memref<9x128x128xbf16, #tpu.memory_space<vmem>>, vector<1x128x128xbf16>
    %67 = vector.shape_cast %66 : vector<1x128x128xbf16> to vector<128x128xbf16>
    %cst_26 = arith.constant dense<0.000000e+00> : vector<64x128xf32>
    %68 = tpu.matmul %65, %67, %cst_26 {dimension_numbers = #tpu.dot_dimension_numbers<[1], [0], [0], [1], [0, 0, 1, 1], [], []>} : vector<64x128xbf16>, vector<128x128xbf16>, vector<64x128xf32> -> vector<64x128xf32>
    %69 = arith.addf %62, %68 : vector<64x128xf32>
    %70 = vector.extract_strided_slice %26 {offsets = [2, 0, 0], sizes = [8, 8, 128], strides = [1, 1, 1]} : vector<10x10x128xf32> to vector<8x8x128xf32>
    %71 = vector.shape_cast %70 : vector<8x8x128xf32> to vector<64x128xf32>
    %72 = arith.truncf %71 : vector<64x128xf32> to vector<64x128xbf16>
    %c6 = arith.constant 6 : index
    %c0_27 = arith.constant 0 : index
    %c0_28 = arith.constant 0 : index
    %73 = vector.load %arg3[%c6, %c0_27, %c0_28] : memref<9x128x128xbf16, #tpu.memory_space<vmem>>, vector<1x128x128xbf16>
    %74 = vector.shape_cast %73 : vector<1x128x128xbf16> to vector<128x128xbf16>
    %cst_29 = arith.constant dense<0.000000e+00> : vector<64x128xf32>
    %75 = tpu.matmul %72, %74, %cst_29 {dimension_numbers = #tpu.dot_dimension_numbers<[1], [0], [0], [1], [0, 0, 1, 1], [], []>} : vector<64x128xbf16>, vector<128x128xbf16>, vector<64x128xf32> -> vector<64x128xf32>
    %76 = arith.addf %69, %75 : vector<64x128xf32>
    %77 = vector.extract_strided_slice %26 {offsets = [2, 1, 0], sizes = [8, 8, 128], strides = [1, 1, 1]} : vector<10x10x128xf32> to vector<8x8x128xf32>
    %78 = vector.shape_cast %77 : vector<8x8x128xf32> to vector<64x128xf32>
    %79 = arith.truncf %78 : vector<64x128xf32> to vector<64x128xbf16>
    %c7 = arith.constant 7 : index
    %c0_30 = arith.constant 0 : index
    %c0_31 = arith.constant 0 : index
    %80 = vector.load %arg3[%c7, %c0_30, %c0_31] : memref<9x128x128xbf16, #tpu.memory_space<vmem>>, vector<1x128x128xbf16>
    %81 = vector.shape_cast %80 : vector<1x128x128xbf16> to vector<128x128xbf16>
    %cst_32 = arith.constant dense<0.000000e+00> : vector<64x128xf32>
    %82 = tpu.matmul %79, %81, %cst_32 {dimension_numbers = #tpu.dot_dimension_numbers<[1], [0], [0], [1], [0, 0, 1, 1], [], []>} : vector<64x128xbf16>, vector<128x128xbf16>, vector<64x128xf32> -> vector<64x128xf32>
    %83 = arith.addf %76, %82 : vector<64x128xf32>
    %84 = vector.extract_strided_slice %26 {offsets = [2, 2, 0], sizes = [8, 8, 128], strides = [1, 1, 1]} : vector<10x10x128xf32> to vector<8x8x128xf32>
    %85 = vector.shape_cast %84 : vector<8x8x128xf32> to vector<64x128xf32>
    %86 = arith.truncf %85 : vector<64x128xf32> to vector<64x128xbf16>
    %c8 = arith.constant 8 : index
    %c0_33 = arith.constant 0 : index
    %c0_34 = arith.constant 0 : index
    %87 = vector.load %arg3[%c8, %c0_33, %c0_34] : memref<9x128x128xbf16, #tpu.memory_space<vmem>>, vector<1x128x128xbf16>
    %88 = vector.shape_cast %87 : vector<1x128x128xbf16> to vector<128x128xbf16>
    %cst_35 = arith.constant dense<0.000000e+00> : vector<64x128xf32>
    %89 = tpu.matmul %86, %88, %cst_35 {dimension_numbers = #tpu.dot_dimension_numbers<[1], [0], [0], [1], [0, 0, 1, 1], [], []>} : vector<64x128xbf16>, vector<128x128xbf16>, vector<64x128xf32> -> vector<64x128xf32>
    %90 = arith.addf %83, %89 : vector<64x128xf32>
    %cst_36 = arith.constant 0.000000e+00 : f32
    %91 = vector.broadcast %cst_36 : f32 to vector<1x8x128xf32>
    %c0_37 = arith.constant 0 : index
    %c0_38 = arith.constant 0 : index
    %c0_39 = arith.constant 0 : index
    %92 = vector.load %arg5[%c0_37, %c0_38, %c0_39] : memref<1x8x128xf32, #tpu.memory_space<vmem>>, vector<1x8x128xf32>
    tpu.vector_store %arg5[%c0_37, %c0_38, %c0_39], %91 {strides = array<i32>} : memref<1x8x128xf32, #tpu.memory_space<vmem>>, vector<1x8x128xf32>,
    %cst_40 = arith.constant dense<0.000000e+00> : vector<128xf32>
    %93 = vector.multi_reduction <add>, %90, %cst_40 [0] : vector<64x128xf32> to vector<128xf32>
    %94 = vector.shape_cast %93 : vector<128xf32> to vector<1x128xf32>
    %cst_41 = arith.constant 1.562500e-02 : f32
    %95 = vector.broadcast %cst_41 : f32 to vector<1x128xf32>
    %96 = arith.mulf %94, %95 : vector<1x128xf32>
    %97 = vector.broadcast %96 : vector<1x128xf32> to vector<64x128xf32>
    %98 = arith.subf %90, %97 : vector<64x128xf32>
    %99 = arith.mulf %98, %98 : vector<64x128xf32>
    %cst_42 = arith.constant dense<0.000000e+00> : vector<128xf32>
    %100 = vector.multi_reduction <add>, %99, %cst_42 [0] : vector<64x128xf32> to vector<128xf32>
    %101 = vector.shape_cast %100 : vector<128xf32> to vector<1x128xf32>
    %c0_43 = arith.constant 0 : index
    %c0_44 = arith.constant 0 : index
    %c0_45 = arith.constant 0 : index
    %102 = vector.load %arg5[%c0_43, %c0_44, %c0_45] : memref<1x8x128xf32, #tpu.memory_space<vmem>>, vector<1x1x128xf32>
    %103 = vector.shape_cast %102 : vector<1x1x128xf32> to vector<1x128xf32>
    %104 = vector.shape_cast %94 : vector<1x128xf32> to vector<1x1x128xf32>
    tpu.vector_store %arg5[%c0_43, %c0_44, %c0_45], %104 {strides = array<i32>} : memref<1x8x128xf32, #tpu.memory_space<vmem>>, vector<1x1x128xf32>,
    %c0_46 = arith.constant 0 : index
    %c1_47 = arith.constant 1 : index
    %c0_48 = arith.constant 0 : index
    %105 = vector.load %arg5[%c0_46, %c1_47, %c0_48] : memref<1x8x128xf32, #tpu.memory_space<vmem>>, vector<1x1x128xf32>
    %106 = vector.shape_cast %105 : vector<1x1x128xf32> to vector<1x128xf32>
    %107 = vector.shape_cast %101 : vector<1x128xf32> to vector<1x1x128xf32>
    tpu.vector_store %arg5[%c0_46, %c1_47, %c0_48], %107 {strides = array<i32>} : memref<1x8x128xf32, #tpu.memory_space<vmem>>, vector<1x1x128xf32>,
    %108 = vector.shape_cast %90 : vector<64x128xf32> to vector<8x8x128xf32>
    %109 = arith.truncf %108 : vector<8x8x128xf32> to vector<8x8x128xbf16>
    %c0_49 = arith.constant 0 : index
    %c0_50 = arith.constant 0 : index
    %c0_51 = arith.constant 0 : index
    %c0_52 = arith.constant 0 : index
    %110 = vector.load %arg4[%c0_49, %c0_50, %c0_51, %c0_52] : memref<1x8x8x128xbf16, #tpu.memory_space<vmem>>, vector<1x8x8x128xbf16>
    %111 = vector.shape_cast %110 : vector<1x8x8x128xbf16> to vector<8x8x128xbf16>
    %112 = vector.shape_cast %109 : vector<8x8x128xbf16> to vector<1x8x8x128xbf16>
    tpu.vector_store %arg4[%c0_49, %c0_50, %c0_51, %c0_52], %112 {strides = array<i32>} : memref<1x8x8x128xbf16, #tpu.memory_space<vmem>>, vector<1x8x8x128xbf16>,
    return
  }
  func.func @transform_0(%arg0: i32) -> (i32, i32, i32, i32) {
    %c0_i32 = arith.constant 0 : i32
    %c0_i32_0 = arith.constant 0 : i32
    %c0_i32_1 = arith.constant 0 : i32
    %c0_i32_2 = arith.constant 0 : i32
    return %arg0, %c0_i32, %c0_i32_0, %c0_i32_1 : i32, i32, i32, i32
  }
  func.func @transform_1(%arg0: i32) -> (i32, i32) {
    %c0_i32 = arith.constant 0 : i32
    %c0_i32_0 = arith.constant 0 : i32
    %c0_i32_1 = arith.constant 0 : i32
    return %c0_i32, %c0_i32_0 : i32, i32
  }
  func.func @transform_2(%arg0: i32) -> (i32, i32, i32) {
    %c0_i32 = arith.constant 0 : i32
    %c0_i32_0 = arith.constant 0 : i32
    %c0_i32_1 = arith.constant 0 : i32
    %c0_i32_2 = arith.constant 0 : i32
    return %c0_i32, %c0_i32_0, %c0_i32_1 : i32, i32, i32
  }
  func.func @transform_3(%arg0: i32) -> (i32, i32, i32, i32) {
    %c0_i32 = arith.constant 0 : i32
    %c0_i32_0 = arith.constant 0 : i32
    %c0_i32_1 = arith.constant 0 : i32
    %c0_i32_2 = arith.constant 0 : i32
    return %arg0, %c0_i32, %c0_i32_0, %c0_i32_1 : i32, i32, i32, i32
  }
  func.func @transform_4(%arg0: i32) -> (i32, i32, i32) {
    %c0_i32 = arith.constant 0 : i32
    %c0_i32_0 = arith.constant 0 : i32
    %c0_i32_1 = arith.constant 0 : i32
    return %arg0, %c0_i32, %c0_i32_0 : i32, i32, i32
  }
}

module attributes {stable_mosaic.version = 11 : i64} {
  func.func @_bn_residual_relu_kernel(%arg0: i32, %arg1: memref<1x8x8x128xbf16, #tpu.memory_space<vmem>>, %arg2: memref<1x8x8x128xbf16, #tpu.memory_space<vmem>>, %arg3: memref<8x128xf32, #tpu.memory_space<vmem>>, %arg4: memref<1x8x8x128xf32, #tpu.memory_space<vmem>>) attributes {dimension_semantics = [#tpu.dimension_semantics<parallel>], iteration_bounds = array<i64: 2>, scalar_prefetch = 0 : i64, scratch_operands = 0 : i64, tpu.core_type = #tpu.core_type<tc>, window_params = [{transform_indices = @transform_0, window_bounds = array<i64: 1, 8, 8, 128>}, {transform_indices = @transform_1, window_bounds = array<i64: 1, 8, 8, 128>}, {pipeline_mode = #tpu.pipeline_mode<synchronous>, transform_indices = @transform_2, window_bounds = array<i64: 8, 128>}, {transform_indices = @transform_3, window_bounds = array<i64: 1, 8, 8, 128>}]} {
    %c0 = arith.constant 0 : index
    %c0_0 = arith.constant 0 : index
    %0 = vector.load %arg3[%c0, %c0_0] : memref<8x128xf32, #tpu.memory_space<vmem>>, vector<8x128xf32>
    %c0_1 = arith.constant 0 : index
    %c0_2 = arith.constant 0 : index
    %c0_3 = arith.constant 0 : index
    %c0_4 = arith.constant 0 : index
    %1 = vector.load %arg1[%c0_1, %c0_2, %c0_3, %c0_4] : memref<1x8x8x128xbf16, #tpu.memory_space<vmem>>, vector<1x8x8x128xbf16>
    %2 = vector.shape_cast %1 : vector<1x8x8x128xbf16> to vector<8x8x128xbf16>
    %3 = arith.extf %2 : vector<8x8x128xbf16> to vector<8x8x128xf32>
    %4 = vector.extract_strided_slice %0 {offsets = [0, 0], sizes = [1, 128], strides = [1, 1]} : vector<8x128xf32> to vector<1x128xf32>
    %5 = vector.shape_cast %4 : vector<1x128xf32> to vector<1x1x128xf32>
    %6 = vector.broadcast %5 : vector<1x1x128xf32> to vector<8x8x128xf32>
    %7 = arith.mulf %3, %6 : vector<8x8x128xf32>
    %8 = vector.extract_strided_slice %0 {offsets = [1, 0], sizes = [1, 128], strides = [1, 1]} : vector<8x128xf32> to vector<1x128xf32>
    %9 = vector.shape_cast %8 : vector<1x128xf32> to vector<1x1x128xf32>
    %10 = vector.broadcast %9 : vector<1x1x128xf32> to vector<8x8x128xf32>
    %11 = arith.addf %7, %10 : vector<8x8x128xf32>
    %c0_5 = arith.constant 0 : index
    %c0_6 = arith.constant 0 : index
    %c0_7 = arith.constant 0 : index
    %c0_8 = arith.constant 0 : index
    %12 = vector.load %arg2[%c0_5, %c0_6, %c0_7, %c0_8] : memref<1x8x8x128xbf16, #tpu.memory_space<vmem>>, vector<1x8x8x128xbf16>
    %13 = vector.shape_cast %12 : vector<1x8x8x128xbf16> to vector<8x8x128xbf16>
    %14 = arith.extf %13 : vector<8x8x128xbf16> to vector<8x8x128xf32>
    %15 = vector.extract_strided_slice %0 {offsets = [2, 0], sizes = [1, 128], strides = [1, 1]} : vector<8x128xf32> to vector<1x128xf32>
    %16 = vector.shape_cast %15 : vector<1x128xf32> to vector<1x1x128xf32>
    %17 = vector.broadcast %16 : vector<1x1x128xf32> to vector<8x8x128xf32>
    %18 = arith.mulf %14, %17 : vector<8x8x128xf32>
    %19 = vector.extract_strided_slice %0 {offsets = [3, 0], sizes = [1, 128], strides = [1, 1]} : vector<8x128xf32> to vector<1x128xf32>
    %20 = vector.shape_cast %19 : vector<1x128xf32> to vector<1x1x128xf32>
    %21 = vector.broadcast %20 : vector<1x1x128xf32> to vector<8x8x128xf32>
    %22 = arith.addf %18, %21 : vector<8x8x128xf32>
    %23 = arith.addf %11, %22 : vector<8x8x128xf32>
    %cst = arith.constant 0.000000e+00 : f32
    %24 = vector.broadcast %cst : f32 to vector<8x8x128xf32>
    %25 = arith.maximumf %23, %24 : vector<8x8x128xf32>
    %c0_9 = arith.constant 0 : index
    %c0_10 = arith.constant 0 : index
    %c0_11 = arith.constant 0 : index
    %c0_12 = arith.constant 0 : index
    %26 = vector.load %arg4[%c0_9, %c0_10, %c0_11, %c0_12] : memref<1x8x8x128xf32, #tpu.memory_space<vmem>>, vector<1x8x8x128xf32>
    %27 = vector.shape_cast %26 : vector<1x8x8x128xf32> to vector<8x8x128xf32>
    %28 = vector.shape_cast %25 : vector<8x8x128xf32> to vector<1x8x8x128xf32>
    tpu.vector_store %arg4[%c0_9, %c0_10, %c0_11, %c0_12], %28 {strides = array<i32>} : memref<1x8x8x128xf32, #tpu.memory_space<vmem>>, vector<1x8x8x128xf32>,
    return
  }
  func.func @transform_0(%arg0: i32) -> (i32, i32, i32, i32) {
    %c0_i32 = arith.constant 0 : i32
    %c0_i32_0 = arith.constant 0 : i32
    %c0_i32_1 = arith.constant 0 : i32
    %c0_i32_2 = arith.constant 0 : i32
    return %arg0, %c0_i32, %c0_i32_0, %c0_i32_1 : i32, i32, i32, i32
  }
  func.func @transform_1(%arg0: i32) -> (i32, i32, i32, i32) {
    %c0_i32 = arith.constant 0 : i32
    %c0_i32_0 = arith.constant 0 : i32
    %c0_i32_1 = arith.constant 0 : i32
    %c0_i32_2 = arith.constant 0 : i32
    return %arg0, %c0_i32, %c0_i32_0, %c0_i32_1 : i32, i32, i32, i32
  }
  func.func @transform_2(%arg0: i32) -> (i32, i32) {
    %c0_i32 = arith.constant 0 : i32
    %c0_i32_0 = arith.constant 0 : i32
    %c0_i32_1 = arith.constant 0 : i32
    return %c0_i32, %c0_i32_0 : i32, i32
  }
  func.func @transform_3(%arg0: i32) -> (i32, i32, i32, i32) {
    %c0_i32 = arith.constant 0 : i32
    %c0_i32_0 = arith.constant 0 : i32
    %c0_i32_1 = arith.constant 0 : i32
    %c0_i32_2 = arith.constant 0 : i32
    return %arg0, %c0_i32, %c0_i32_0, %c0_i32_1 : i32, i32, i32, i32
  }
}

</mosaic_0001>

<bundles_post_ra>
// kernel: res_block_forward.5
= control target key start
LH: loop header
LB: loop body
LE: loop exit
PB: predicated region body
PF: predicated region fallthrough
CT: control target
= control target key end

     0   :  { %s453_s12 = smov 0   ;;  %s542_s0 = inlined_call_operand.vmem [shape: bf16[2,8,8,128], index: 0, kind: input, shape index: {}]   ;;  %s543_s1 = inlined_call_operand.vmem [shape: bf16[2,8,8,128], index: 1, kind: input, shape index: {}]   ;;  %s544_s2 = inlined_call_operand.vmem [shape: f32[8,128], index: 2, kind: input, shape index: {}]   ;;  %s545_s3 = inlined_call_operand.vmem [shape: f32[2,8,8,128], index: 3, kind: output, shape index: {}]  }
   0x1 LB: > { %s363_s13 = sadd.s32 4294967295, %s431_s12   ;;  %p367_p0 = scmp.ge.s32.totalorder %s431_s12, 1  ;;  %s431_s12 = sphi %s453_s12, %s13_s12  }
   0x2   : > { %p147_p1 = scmp.lt.s32.totalorder %s431_s12, 3 }
   0x4   : > { %p148_p2 = pnand %p367_p0, %p147_p1 }
   0x5   : > { %p176_p3 = scmp.lt.s32.totalorder (!%p148_p2), %s363_s13, 1  ;;  %v208_v0 = vlaneseq (!%p148_p2)  ;;  %v191_v2 = vld [vmem:[%s544_s2] sm:$0xff] (!%p148_p2) }
   0x6   : > { %151 = sbr.rel (%p148_p2) target bundleno = 39 (0x27), region = 32 }
   0x7   : > { %v209_v1 = vshrl.u32 (!%p148_p2), %v208_v0, 7 }
   0x9   : > { %v210_v3 = vsub.s32 (!%p148_p2), 0, %v209_v1  ;;  %v222_v4 = vsub.s32 (!%p148_p2), 1, %v209_v1  ;;  %v250_v5 = vsub.s32 (!%p148_p2), 2, %v209_v1  ;;  %v262_v6 = vsub.s32 (!%p148_p2), 3, %v209_v1 }
   0xb   : > { %v478_v8 = vrot.slane (!%p148_p2), %v191_v2, %v210_v3  ;;  %v480_v9 = vrot.slane (!%p148_p2), %v191_v2, %v222_v4  ;;  %v483_v11 = vrot.slane (!%p148_p2), %v191_v2, %v250_v5  ;;  %v485_v12 = vrot.slane (!%p148_p2), %v191_v2, %v262_v6 }
   0xd   : > { %s547_s13 = smov (!%p176_p3, %s363_s13), 1 }
   0xe   : > { %s376_s16 = sshll.u32 %s547_s13, 5  ;;  %s378_s23 = sshll.u32 %s547_s13, 6 }
   0xf   : > { %s470_s19 = scalar_lea.vmem %s542_s0, %s376_s16  ;;  %s475_s22 = scalar_lea.vmem %s543_s1, %s376_s16 }
  0x10   : > { %v380_v7 = vld [vmem:[%s470_s19] sm:$0xff]   ;;  %v411_v13 = vld [vmem:[%s470_s19 + $0x8] sm:$0xff]   ;;  %v412_v31 = vld [vmem:[%s470_s19 + $0x10] sm:$0xff]   ;;  %s511_s26 = scalar_lea.vmem %s545_s3, %s378_s23 }
  0x11   : > { %v396_v10 = vld [vmem:[%s475_s22] sm:$0xff]   ;;  %v381_v14 = vunpack.c.l.bf16 %v380_v7  ;;  %v382_v16 = vunpack.c.h.bf16 %v380_v7  ;;  %v414_v18 = vld [vmem:[%s475_s22 + $0x8] sm:$0xff]   ;;  %v385_v19 = vunpack.c.l.bf16 %v411_v13  ;;  %v386_v21 = vunpack.c.h.bf16 %v411_v13  ;;  %v415_v32 = vld [vmem:[%s475_s22 + $0x10] sm:$0xff]  }
  0x12   : > { %v397_v15 = vunpack.c.l.bf16 %v396_v10  ;;  %v398_v17 = vunpack.c.h.bf16 %v396_v10  ;;  %v401_v20 = vunpack.c.l.bf16 %v414_v18  ;;  %v402_v22 = vunpack.c.h.bf16 %v414_v18  ;;  %v413_v49 = vld [vmem:[%s470_s19 + $0x18] sm:$0xff]  }
  0x13   : > { %v212_v23 = vmul.f32 %v381_v14, %v478_v8  ;;  %v213_v25 = vmul.f32 %v382_v16, %v478_v8  ;;  %v214_v27 = vmul.f32 %v385_v19, %v478_v8  ;;  %v215_v29 = vmul.f32 %v386_v21, %v478_v8  ;;  %v416_v50 = vld [vmem:[%s475_s22 + $0x18] sm:$0xff]  }
  0x14   : > { %v252_v24 = vmul.f32 %v397_v15, %v483_v11  ;;  %v253_v26 = vmul.f32 %v398_v17, %v483_v11  ;;  %v254_v28 = vmul.f32 %v401_v20, %v483_v11  ;;  %v255_v30 = vmul.f32 %v402_v22, %v483_v11 }
  0x15   : > { %v224_v33 = vadd.f32 %v480_v9, %v212_v23  ;;  %v225_v35 = vadd.f32 %v480_v9, %v213_v25  ;;  %v226_v37 = vadd.f32 %v480_v9, %v214_v27  ;;  %v227_v39 = vadd.f32 %v480_v9, %v215_v29 }
  0x16   : > { %v264_v34 = vadd.f32 %v485_v12, %v252_v24  ;;  %v265_v36 = vadd.f32 %v485_v12, %v253_v26  ;;  %v266_v38 = vadd.f32 %v485_v12, %v254_v28  ;;  %v267_v40 = vadd.f32 %v485_v12, %v255_v30 }
  0x17   : > { %v389_v43 = vunpack.c.l.bf16 %v412_v31  ;;  %v405_v44 = vunpack.c.l.bf16 %v415_v32  ;;  %v390_v47 = vunpack.c.h.bf16 %v412_v31  ;;  %v406_v48 = vunpack.c.h.bf16 %v415_v32 }
  0x18   : > { %v272_v41 = vadd.f32 %v264_v34, %v224_v33  ;;  %v273_v42 = vadd.f32 %v265_v36, %v225_v35  ;;  %v274_v45 = vadd.f32 %v266_v38, %v226_v37  ;;  %v275_v46 = vadd.f32 %v267_v40, %v227_v39 }
  0x19   : > { %v216_v53 = vmul.f32 %v389_v43, %v478_v8  ;;  %v256_v54 = vmul.f32 %v405_v44, %v483_v11  ;;  %v217_v57 = vmul.f32 %v390_v47, %v478_v8  ;;  %v257_v58 = vmul.f32 %v406_v48, %v483_v11 }
  0x1a   : > { %v280_v51 = vmax.f32 %v272_v41, 0.0  ;;  %v281_v52 = vmax.f32 %v273_v42, 0.0  ;;  %v282_v55 = vmax.f32 %v274_v45, 0.0  ;;  %v283_v56 = vmax.f32 %v275_v46, 0.0 }
  0x1b   : > { %v228_v59 = vadd.f32 %v480_v9, %v216_v53  ;;  %v268_v60 = vadd.f32 %v485_v12, %v256_v54  ;;  %v393_v61 = vunpack.c.l.bf16 %v413_v49  ;;  %v409_v62 = vunpack.c.l.bf16 %v416_v50 }
  0x1c   : > { %288 = vst [vmem:[%s511_s26] sm:$0xff] %v280_v51  ;;  %289 = vst [vmem:[%s511_s26 + $0x8] sm:$0xff] %v281_v52  ;;  %v229_v63 = vadd.f32 %v480_v9, %v217_v57  ;;  %v269_v0 = vadd.f32 %v485_v12, %v257_v58  ;;  %v394_v1 = vunpack.c.h.bf16 %v413_v49  ;;  %v410_v2 = vunpack.c.h.bf16 %v416_v50 }
  0x1d   : > { %290 = vst [vmem:[%s511_s26 + $0x10] sm:$0xff] %v282_v55  ;;  %291 = vst [vmem:[%s511_s26 + $0x18] sm:$0xff] %v283_v56  ;;  %v276_v3 = vadd.f32 %v268_v60, %v228_v59  ;;  %v218_v4 = vmul.f32 %v393_v61, %v478_v8  ;;  %v258_v5 = vmul.f32 %v409_v62, %v483_v11 }
  0x1e   : > { %v277_v6 = vadd.f32 %v269_v0, %v229_v63  ;;  %v219_v7 = vmul.f32 %v394_v1, %v478_v8  ;;  %v259_v10 = vmul.f32 %v410_v2, %v483_v11 }
  0x1f   : > { %v284_v13 = vmax.f32 %v276_v3, 0.0  ;;  %v230_v14 = vadd.f32 %v480_v9, %v218_v4  ;;  %v270_v15 = vadd.f32 %v485_v12, %v258_v5 }
  0x20   : > { %v285_v16 = vmax.f32 %v277_v6, 0.0  ;;  %v231_v17 = vadd.f32 %v480_v9, %v219_v7  ;;  %v271_v18 = vadd.f32 %v485_v12, %v259_v10 }
  0x21   : > { %292 = vst [vmem:[%s511_s26 + $0x20] sm:$0xff] %v284_v13  ;;  %v278_v19 = vadd.f32 %v270_v15, %v230_v14 }
  0x22   : > { %293 = vst [vmem:[%s511_s26 + $0x28] sm:$0xff] %v285_v16  ;;  %v279_v20 = vadd.f32 %v271_v18, %v231_v17 }
  0x23   : > { %v286_v21 = vmax.f32 %v278_v19, 0.0 }
  0x24   : > { %v287_v22 = vmax.f32 %v279_v20, 0.0 }
  0x25   : > { %294 = vst [vmem:[%s511_s26 + $0x30] sm:$0xff] %v286_v21 }
  0x26   : > { %295 = vst [vmem:[%s511_s26 + $0x38] sm:$0xff] %v287_v22 }
  0x27 PF: > { %s13_s12 = sadd.s32 1, %s431_s12  }
  0x28   : > { %p10_p4 = scmp.ge.s32.totalorder %s13_s12, 4  }
  0x2a   :  { %12 = sbr.rel (!%p10_p4) target bundleno = 1 (0x1), region = 65 }

// kernel: res_block_forward.3
= control target key start
LH: loop header
LB: loop body
LE: loop exit
PB: predicated region body
PF: predicated region fallthrough
CT: control target
= control target key end

     0   :  { %s2026_s18 = smov 0   ;;  %s2406_s0 = inlined_call_operand.vmem [shape: bf16[2,36,9,4], index: 0, kind: input, shape index: {}]   ;;  %s2407_s1 = inlined_call_operand.vmem [shape: bf16[9,4,128], index: 1, kind: input, shape index: {}]   ;;  %s2408_s2 = inlined_call_operand.vmem [shape: bf16[4,128], index: 2, kind: input, shape index: {}]   ;;  %s2409_s3 = inlined_call_operand.vmem [shape: bf16[2,8,8,128], index: 3, kind: output, shape index: {0}]   ;;  %s2410_s4 = inlined_call_operand.vmem [shape: bf16[2,8,8,128], index: 4, kind: output, shape index: {1}]   ;;  %s2411_s5 = inlined_call_operand.vmem [shape: f32[2,8,128], index: 5, kind: output, shape index: {2}]  }
   0x1 LB: > { %s1596_s19 = sadd.s32 4294967295, %s1993_s18   ;;  %p1600_p0 = scmp.ge.s32.totalorder %s1993_s18, 1  ;;  %s1993_s18 = sphi %s2026_s18, %s16_s18  }
   0x2   : > { %p192_p1 = scmp.lt.s32.totalorder %s1993_s18, 3 }
   0x4   : > { %p193_p2 = pnand %p1600_p0, %p192_p1 }
   0x5   : > { %vm375_vm0 = vcmask (!%p193_p2), 1041408   ;;  %v1642_v0 = vld [vmem:[%s2407_s1 + $0x8] sm:$0x3] (!%p193_p2)  ;;  %v1615_v1 = vld [vmem:[%s2407_s1 + $0x2] sm:$0x3] (!%p193_p2)  ;;  %p229_p3 = scmp.lt.s32.totalorder (!%p193_p2), %s1596_s19, 1 }
   0x6   : > { %196 = sbr.rel (%p193_p2) target bundleno = 362 (0x16a), region = 32  ;;  %1947 = vmatprep.subr.msk.bf16.mxu0 (!%p193_p2), %vm375_vm0, %v1642_v0  ;;  %1943 = vmatprep.subr.msk.bf16.mxu1 (!%p193_p2), %vm375_vm0, %v1615_v1  ;;  %v780_v2 = vsel (!%p193_p2), %vm375_vm0, %v1642_v0, 0  ;;  %v377_v3 = vsel (!%p193_p2), %vm375_vm0, %v1615_v1, 0  ;;  %v1647_v4 = vld [vmem:[%s2407_s1 + $0xa] sm:$0x3] (!%p193_p2)  ;;  %vm362_vm1 = vcmask (!%p193_p2), 31744  }
   0x7   : > { %1820 = vmatpush3.bf16.msra.mxu0 (!%p193_p2), %v780_v2  ;;  %1780 = vmatpush3.bf16.msra.mxu1 (!%p193_p2), %v377_v3  ;;  %v355_v5 = vld [vmem:[%s2407_s1] sm:$0x3] (!%p193_p2)  ;;  %v922_v6 = vsel (!%p193_p2), %vm375_vm0, %v1647_v4, 0  ;;  %v1656_v16 = vld [vmem:[%s2407_s1 + $0xc] sm:$0x3] (!%p193_p2)  ;;  %vm540_vm2 = vcmask (!%p193_p2), 1046528  }
   0x8   : > { %1948 = vmatprep.subr.msk.bf16.mxu0 (!%p193_p2), %vm375_vm0, %v1647_v4  ;;  %1944 = vmatprep.subr.msk.bf16.mxu1 (!%p193_p2), %vm375_vm0, %v355_v5  ;;  %v457_v7 = vsel (!%p193_p2), %vm375_vm0, %v355_v5, 0  ;;  %v1624_v19 = vld [vmem:[%s2407_s1 + $0x4] sm:$0x3] (!%p193_p2)  ;;  %v2130_v34 = vsel (!%p193_p2), %vm375_vm0, %v1656_v16, 0 }
   0x9   : > { %v592_v49 = vsel (!%p193_p2), %vm375_vm0, %v1624_v19, 0 }
   0xd   : > { %s2413_s19 = smov (!%p229_p3, %s1596_s19), 1 }
   0xe   : > { %s1953_s28 = smul.u32 288, %s2413_s19  ;;  %s1606_s21 = sshll.u32 %s2413_s19, 3 }
   0xf   : > { %s2342_s24 = scalar_lea.vmem %s2411_s5, %s1606_s21  ;;  %s1681_s25 = sshll.u32 %s2413_s19, 5 }
  0x10   : > { %s2058_s6 = scalar_lea.vmem %s2406_s0, %s1953_s28  ;;  %s2355_s28 = scalar_lea.vmem %s2410_s4, %s1681_s25 }
  0x11   : > { %v267_v8 = vld [vmem:[%s2058_s6 + $0x48] sm:$0xf]  ;;  %v2064_v9 = vld [vmem:[%s2058_s6 + $0x50] sm:$0xf]  ;;  %v2067_v10 = vld [vmem:[%s2058_s6 + $0x58] sm:$0xf]  ;;  %s2370_s30 = scalar_lea.vmem %s2409_s3, %s1681_s25 }
  0x12   : > { %v2070_v11 = vld [vmem:[%s2058_s6 + $0x60] sm:$0xf]  ;;  %v2073_v12 = vld [vmem:[%s2058_s6 + $0x68] sm:$0xf]  ;;  %v1611_v13 = vcombine.low %v267_v8, %v2064_v9  ;;  %v2089_v18 = vld [vmem:[%s2058_s6 + $0x70] sm:$0xf] }
  0x13   : > { %v1612_v14 = vcombine.low %v2067_v10, %v2070_v11  ;;  %v2079_v15 = vld [vmem:[%s2058_s6 + $0xd8] ss:$8 sps:$4 sm:$0xff]   ;;  %v2086_v17 = vld [vmem:[%s2058_s6 + $0xe8] ss:$8 sps:$4 sm:$0xff]   ;;  %v1613_v20 = vcombine.low %v2073_v12, %v2089_v18  ;;  %v277_v28 = vld [vmem:[%s2058_s6 + $0x94] sm:$0x1] }
  0x14   : > { %1781 = vmatprep.mubr.msk.bf16.mxu1 %vm362_vm1, %v1611_v13  ;;  %1821 = vmatprep.mubr.msk.bf16.mxu0 %vm362_vm1, %v2079_v15  ;;  %v2100_v21 = vld [vmem:[%s2058_s6 + $0xf8] ss:$8 sps:$4 sm:$0xff]   ;;  %v2115_v25 = vld [vmem:[%s2058_s6 + $0x8] sm:$0xf]  ;;  %v2118_v27 = vld [vmem:[%s2058_s6 + $0x90] sm:$0xf]  ;;  %v328_v33 = vunpack.c.l.bf16 %v277_v28 }
  0x15   : > { %1782 = vmatmul.mubr.msk.bf16.vlgmr.msra.gmra.mrb[0].mxu1 %vm362_vm1, %v1612_v14  ;;  %1822 = vmatmul.mubr.msk.bf16.vlgmr.msra.gmra.mrb[0].mxu0 %vm362_vm1, %v2086_v17  ;;  %v2105_v22 = vld [vmem:[%s2058_s6 + $0x78] sm:$0xf]  ;;  %v2108_v23 = vld [vmem:[%s2058_s6 + $0x80] sm:$0xf]  ;;  %v279_v31 = vld [vmem:[%s2058_s6 + $0x9c] sm:$0x1]  ;;  %v327_v32 = vunpack.c.l.bf16 %v2118_v27  ;;  %v302_v36 = vunpack.c.l.bf16 %v2115_v25 }
  0x16   : > { %1790 = vmatpush3.bf16.msra.mxu1 %v457_v7  ;;  %1830 = vmatpush3.bf16.msra.mxu0 %v922_v6  ;;  %v249_v24 = vld [vmem:[%s2058_s6] sm:$0xf]  ;;  %v1614_v29 = vcombine.low %v2105_v22, %v2108_v23  ;;  %v2125_v30 = vld [vmem:[%s2058_s6 + $0x98] sm:$0xf]  ;;  %v2134_v35 = vld [vmem:[%s2058_s6 + $0x108] ss:$8 sps:$4 sm:$0xff]   ;;  %v330_v39 = vunpack.c.l.bf16 %v279_v31 }
  0x17   : > { %1785 = vmatprep.mubr.msk.bf16.mxu1 %vm362_vm1, %v1613_v20  ;;  %1825 = vmatprep.mubr.msk.bf16.mxu0 %vm362_vm1, %v2100_v21  ;;  %v300_v26 = vunpack.c.l.bf16 %v249_v24  ;;  %v1607_v37 = vcombine.low %v249_v24, %v2115_v25  ;;  %v329_v38 = vunpack.c.l.bf16 %v2125_v30  ;;  %v2140_v40 = vld [vmem:[%s2058_s6 + $0xa0] sm:$0xf]  ;;  %v871_v41 = vrot.slane %v327_v32, 1  ;;  %v2143_v43 = vld [vmem:[%s2058_s6 + $0x10] sm:$0xf] }
  0x18   : > { %1949 = vmatprep.subr.msk.bf16.mxu0 %vm375_vm0, %v1656_v16  ;;  %1945 = vmatprep.subr.msk.bf16.mxu1 %vm375_vm0, %v1624_v19  ;;  %v872_v42 = vrot.slane %v328_v33, 1  ;;  %v281_v44 = vld [vmem:[%s2058_s6 + $0xa4] sm:$0x1]  ;;  %v875_v47 = vrot.slane %v330_v39, 1  ;;  %v2149_v48 = vld [vmem:[%s2058_s6 + $0xa8] sm:$0xf]  ;;  %v304_v52 = vunpack.c.l.bf16 %v2143_v43  ;;  %v331_v54 = vunpack.c.l.bf16 %v2140_v40 }
  0x19   : > { %v2146_v45 = vrot.slane %v300_v26, 1  ;;  %v874_v46 = vrot.slane %v329_v38, 1  ;;  %v2155_v51 = vld [vmem:[%s2058_s6 + $0x18] sm:$0xf]  ;;  %v283_v53 = vld [vmem:[%s2058_s6 + $0xac] sm:$0x1]  ;;  %v332_v55 = vunpack.c.l.bf16 %v281_v44  ;;  %v333_v58 = vunpack.c.l.bf16 %v2149_v48 }
  0x1a   : > { %v873_v50 = vsel %vm540_vm2, %v871_v41, %v872_v42  ;;  %v2163_v56 = vrot.slane %v302_v36, 1  ;;  %v334_v59 = vunpack.c.l.bf16 %v283_v53  ;;  %v2168_v60 = vld [vmem:[%s2058_s6 + $0xb0] sm:$0xf]  ;;  %v285_v61 = vld [vmem:[%s2058_s6 + $0xb4] sm:$0x1]  ;;  %v306_v63 = vunpack.c.l.bf16 %v2155_v51 }
  0x1b   : > { %v876_v57 = vsel %vm540_vm2, %v874_v46, %v875_v47  ;;  %v877_v0 = vrot.slane %v331_v54, 1  ;;  %v878_v1 = vrot.slane %v332_v55, 1  ;;  %v2173_v2 = vld [vmem:[%s2058_s6 + $0xb8] sm:$0xf]  ;;  %v287_v3 = vld [vmem:[%s2058_s6 + $0xbc] sm:$0x1]  ;;  %v1608_v4 = vcombine.low %v2143_v43, %v2155_v51 }
  0x1c   : > { %v903_v62 = vpack.c.bf16 %v876_v57, %v873_v50  ;;  %v880_v5 = vrot.slane %v333_v58, 1  ;;  %v881_v6 = vrot.slane %v334_v59, 1  ;;  %v2179_v7 = vld [vmem:[%s2058_s6 + $0x20] sm:$0xf]  ;;  %v2182_v8 = vld [vmem:[%s2058_s6 + $0x28] sm:$0xf]  ;;  %v335_v19 = vunpack.c.l.bf16 %v2168_v60 }
  0x1d   : > { %1786 = vmatmul.mubr.msk.bf16.gmra.mrb[4].mxu1 %vm362_vm1, %v1614_v29  ;;  %1826 = vmatmul.mubr.msk.bf16.gmra.mrb[4].mxu0 %vm362_vm1, %v2134_v35  ;;  %v2185_v13 = vrot.slane %v304_v52, 1  ;;  %v879_v14 = vsel %vm540_vm2, %v877_v0, %v878_v1  ;;  %v308_v16 = vunpack.c.l.bf16 %v2179_v7  ;;  %v2191_v20 = vld [vmem:[%s2058_s6 + $0x30] sm:$0xf]  ;;  %v336_v26 = vunpack.c.l.bf16 %v285_v61  ;;  %v2196_v31 = vld [vmem:[%s2058_s6 + $0x38] sm:$0xf] }
  0x1e   : > { %1791 = vmatprep.mubr.msk.bf16.mxu1 %vm362_vm1, %v1607_v37  ;;  %1831 = vmatprep.mubr.msk.bf16.mxu0 %vm362_vm1, %v903_v62  ;;  %v882_v24 = vsel %vm540_vm2, %v880_v5, %v881_v6  ;;  %v337_v28 = vunpack.c.l.bf16 %v2173_v2  ;;  %v338_v29 = vunpack.c.l.bf16 %v287_v3  ;;  %v2199_v32 = vld [vmem:[%s2058_s6 + $0xc0] sm:$0xf]  ;;  %v289_v33 = vld [vmem:[%s2058_s6 + $0xc4] sm:$0x1]  ;;  %v2202_v36 = vrot.slane %v306_v63, 1 }
  0x1f   : > { %v904_v37 = vpack.c.bf16 %v882_v24, %v879_v14  ;;  %v1609_v38 = vcombine.low %v2179_v7, %v2182_v8  ;;  %v883_v39 = vrot.slane %v335_v19, 1  ;;  %v2207_v41 = vld [vmem:[%s2058_s6 + $0xc8] sm:$0xf]  ;;  %v291_v42 = vld [vmem:[%s2058_s6 + $0xcc] sm:$0x1]  ;;  %v310_v46 = vunpack.c.l.bf16 %v2182_v8 }
  0x20   : > { %v2213_v44 = vld [vmem:[%s2407_s1 + $0xe] sm:$0x3]  ;;  %v884_v47 = vrot.slane %v336_v26, 1  ;;  %v886_v50 = vrot.slane %v337_v28, 1  ;;  %v887_v52 = vrot.slane %v338_v29, 1  ;;  %v553_v54 = vrot.slane %v308_v16, 1 }
  0x21   : > { %v250_v53 = vld [vmem:[%s2058_s6 + $0x4] sm:$0x1]  ;;  %v1610_v55 = vcombine.low %v2191_v20, %v2196_v31  ;;  %v339_v57 = vunpack.c.l.bf16 %v2199_v32  ;;  %v340_v58 = vunpack.c.l.bf16 %v289_v33  ;;  %v252_v59 = vld [vmem:[%s2058_s6 + $0xc] sm:$0x1]  ;;  %v1633_v61 = vld [vmem:[%s2407_s1 + $0x6] sm:$0x3]  ;;  %v341_v0 = vunpack.c.l.bf16 %v2207_v41 }
  0x22   : > { %v885_v62 = vsel %vm540_vm2, %v883_v39, %v884_v47  ;;  %v888_v63 = vsel %vm540_vm2, %v886_v50, %v887_v52  ;;  %v342_v1 = vunpack.c.l.bf16 %v291_v42  ;;  %v254_v3 = vld [vmem:[%s2058_s6 + $0x14] sm:$0x1]  ;;  %v301_v16 = vunpack.c.l.bf16 %v250_v53  ;;  %v258_v19 = vld [vmem:[%s2058_s6 + $0x24] sm:$0x1]  ;;  %v260_v24 = vld [vmem:[%s2058_s6 + $0x2c] sm:$0x1] }
  0x23   : > { %v905_v5 = vpack.c.bf16 %v888_v63, %v885_v62  ;;  %v889_v6 = vrot.slane %v339_v57, 1  ;;  %v890_v14 = vrot.slane %v340_v58, 1  ;;  %v303_v28 = vunpack.c.l.bf16 %v252_v59  ;;  %v262_v57 = vld [vmem:[%s2058_s6 + $0x34] sm:$0x1]  ;;  %v264_v58 = vld [vmem:[%s2058_s6 + $0x3c] sm:$0x1] }
  0x24   : > { %v893_v26 = vrot.slane %v342_v1, 1  ;;  %v1652_v29 = vcombine.low %v2115_v25, %v2143_v43  ;;  %v542_v33 = vrot.slane %v301_v16, 1  ;;  %v309_v47 = vunpack.c.l.bf16 %v258_v19 }
  0x25   : > { %1792 = vmatmul.mubr.msk.bf16.vlgmr.msra.gmra.mrb[0].mxu1 %vm362_vm1, %v1608_v4  ;;  %1832 = vmatmul.mubr.msk.bf16.vlgmr.msra.gmra.mrb[0].mxu0 %vm362_vm1, %v904_v37  ;;  %v256_v4 = vld [vmem:[%s2058_s6 + $0x1c] sm:$0x1]  ;;  %v305_v37 = vunpack.c.l.bf16 %v254_v3  ;;  %v545_v42 = vrot.slane %v303_v28, 1  ;;  %v311_v50 = vunpack.c.l.bf16 %v260_v24  ;;  %v556_v59 = vrot.slane %v310_v46, 1 }
  0x26   : > { %1800 = vmatpush3.bf16.msra.mxu1 %v592_v49  ;;  %1840 = vmatpush3.bf16.msra.mxu0 %v2130_v34  ;;  %v892_v49 = vrot.slane %v341_v0, 1  ;;  %v891_v34 = vsel %vm540_vm2, %v889_v6, %v890_v14  ;;  %v543_v43 = vsel %vm540_vm2, %v2146_v45, %v542_v33  ;;  %v554_v63 = vrot.slane %v309_v47, 1 }
  0x27   : > { %1795 = vmatprep.mubr.msk.bf16.mxu1 %vm362_vm1, %v1609_v38  ;;  %1950 = vmatprep.subr.msk.bf16.mxu0 %vm375_vm0, %v2213_v44  ;;  %v307_v38 = vunpack.c.l.bf16 %v256_v4  ;;  %v548_v52 = vrot.slane %v305_v37, 1  ;;  %v2249_v62 = vsel %vm540_vm2, %v2163_v56, %v545_v42  ;;  %v557_v0 = vrot.slane %v311_v50, 1 }
  0x28   : > { %1946 = vmatprep.subr.msk.bf16.mxu1 %vm375_vm0, %v1633_v61  ;;  %1835 = vmatprep.mubr.msk.bf16.mxu0 %vm362_vm1, %v905_v5  ;;  %v894_v39 = vsel %vm540_vm2, %v892_v49, %v893_v26  ;;  %v312_v1 = vunpack.c.l.bf16 %v2191_v20  ;;  %v314_v3 = vunpack.c.l.bf16 %v2196_v31  ;;  %v573_v4 = vpack.c.bf16 %v2249_v62, %v543_v43 }
  0x29   : > { %v906_v25 = vpack.c.bf16 %v894_v39, %v891_v34  ;;  %v551_v53 = vrot.slane %v307_v38, 1  ;;  %v549_v45 = vsel %vm540_vm2, %v2185_v13, %v548_v52  ;;  %v313_v56 = vunpack.c.l.bf16 %v262_v57 }
  0x2a   : > { %v315_v5 = vunpack.c.l.bf16 %v264_v58  ;;  %v555_v6 = vsel %vm540_vm2, %v553_v54, %v554_v63  ;;  %v1653_v14 = vcombine.low %v2155_v51, %v2179_v7  ;;  %v559_v16 = vrot.slane %v312_v1, 1  ;;  %v1670_v51 = vld [vmem:[%s2407_s1 + $0x10] sm:$0x3] }
  0x2b   : > { %v2260_v46 = vsel %vm540_vm2, %v2202_v36, %v551_v53  ;;  %v562_v19 = vrot.slane %v314_v3, 1  ;;  %v560_v36 = vrot.slane %v313_v56, 1  ;;  %v686_v49 = vsel %vm375_vm0, %v1633_v61, 0 }
  0x2c   : > { %v574_v13 = vpack.c.bf16 %v2260_v46, %v549_v45  ;;  %v563_v24 = vrot.slane %v315_v5, 1  ;;  %v1110_v54 = vsel %vm375_vm0, %v2213_v44, 0  ;;  %v1654_v28 = vcombine.low %v2182_v8, %v2191_v20  ;;  %v1285_v44 = vld [vmem:[%s2408_s2] sm:$0x3] }
  0x2d   : > { %1796 = vmatmul.mubr.msk.bf16.gmra.mrb[4].mxu1 %vm362_vm1, %v1610_v55  ;;  %1836 = vmatmul.mubr.msk.bf16.gmra.mrb[4].mxu0 %vm362_vm1, %v906_v25  ;;  %v2266_v55 = vsel %vm540_vm2, %v556_v59, %v557_v0  ;;  %v561_v7 = vsel %vm540_vm2, %v559_v16, %v560_v36  ;;  %v265_v8 = vld [vmem:[%s2058_s6 + $0x40] sm:$0xf]  ;;  %v1629_v34 = vcombine.low %v2118_v27, %v2125_v30  ;;  %v1287_v27 = vsel %vm375_vm0, %v1285_v44, 0 }
  0x2e   : > { %1801 = vmatprep.mubr.msk.bf16.mxu1 %vm362_vm1, %v573_v4  ;;  %1841 = vmatprep.mubr.msk.bf16.mxu0 %vm362_vm1, %v1652_v29  ;;  %v575_v26 = vpack.c.bf16 %v2266_v55, %v555_v6  ;;  %v564_v61 = vsel %vm540_vm2, %v562_v19, %v563_v24  ;;  %v1655_v29 = vcombine.low %v2196_v31, %v265_v8 }
  0x2f   : > { %v576_v20 = vpack.c.bf16 %v564_v61, %v561_v7  ;;  %v1661_v33 = vcombine.low %v2064_v9, %v2067_v10  ;;  %v1630_v37 = vcombine.low %v2140_v40, %v2149_v48  ;;  %v1662_v31 = vcombine.low %v2070_v11, %v2073_v12  ;;  %v275_v40 = vld [vmem:[%s2058_s6 + $0x88] sm:$0xf] }
  0x30   : > { %v1631_v9 = vcombine.low %v2168_v60, %v2173_v2  ;;  %v1210_v10 = vsel %vm375_vm0, %v1670_v51, 0  ;;  %v1663_v30 = vcombine.low %v2089_v18, %v2105_v22  ;;  %v1632_v11 = vcombine.low %v2199_v32, %v2207_v41  ;;  %v266_v60 = vld [vmem:[%s2058_s6 + $0x44] sm:$0x1] }
  0x31   : > { %v1664_v12 = vcombine.low %v2108_v23, %v275_v40  ;;  %v1191_v48 = vpack.c.bf16 %v549_v45, %v2249_v62  ;;  %v316_v18 = vunpack.c.l.bf16 %v265_v8  ;;  %v317_v22 = vunpack.c.l.bf16 %v266_v60 }
  0x32   : > { %v1192_v2 = vpack.c.bf16 %v555_v6, %v2260_v46  ;;  %v1193_v23 = vpack.c.bf16 %v561_v7, %v2266_v55 }
  0x33   : > { %v1187_v32 = vrot.slane %v316_v18, 1  ;;  %v1188_v41 = vrot.slane %v317_v22, 1 }
  0x35   : > { %1802 = vmatmul.mubr.msk.bf16.vlgmr.msra.gmra.mrb[0].mxu1 %vm362_vm1, %v574_v13  ;;  %1842 = vmatmul.mubr.msk.bf16.vlgmr.msra.gmra.mrb[0].mxu0 %vm362_vm1, %v1653_v14 }
  0x36   : > { %1810 = vmatpush3.bf16.msra.mxu1 %v686_v49  ;;  %1850 = vmatpush3.bf16.msra.mxu0 %v1110_v54 }
  0x37   : > { %1805 = vmatprep.mubr.msk.bf16.mxu1 %vm362_vm1, %v575_v26  ;;  %1845 = vmatprep.mubr.msk.bf16.mxu0 %vm362_vm1, %v1654_v28 }
  0x38   : > { %1951 = vmatprep.subr.msk.bf16.mxu0 %vm375_vm0, %v1670_v51  ;;  %1952 = vmatprep.subr.msk.bf16.mxu1 %vm375_vm0, %v1285_v44 }
  0x3d   : > { %1806 = vmatmul.mubr.msk.bf16.gmra.mrb[4].mxu1 %vm362_vm1, %v576_v20  ;;  %1846 = vmatmul.mubr.msk.bf16.gmra.mrb[4].mxu0 %vm362_vm1, %v1655_v29 }
  0x3e   : > { %1811 = vmatprep.mubr.msk.bf16.mxu1 %vm362_vm1, %v1629_v34  ;;  %1851 = vmatprep.mubr.msk.bf16.mxu0 %vm362_vm1, %v1661_v33 }
  0x45   : > { %1812 = vmatmul.mubr.msk.bf16.vlgmr.msra.gmra.mrb[0].mxu1 %vm362_vm1, %v1630_v37  ;;  %1852 = vmatmul.mubr.msk.bf16.vlgmr.msra.gmra.mrb[0].mxu0 %vm362_vm1, %v1662_v31 }
  0x46   : > { %1870 = vmatpush3.bf16.msra.mxu1 %v1287_v27  ;;  %1860 = vmatpush3.bf16.msra.mxu0 %v1210_v10 }
  0x47   : > { %1815 = vmatprep.mubr.msk.bf16.mxu1 %vm362_vm1, %v1631_v9  ;;  %1855 = vmatprep.mubr.msk.bf16.mxu0 %vm362_vm1, %v1663_v30 }
  0x4d   : > { %1816 = vmatmul.mubr.msk.bf16.gmra.mrb[4].mxu1 %vm362_vm1, %v1632_v11  ;;  %1856 = vmatmul.mubr.msk.bf16.gmra.mrb[4].mxu0 %vm362_vm1, %v1664_v12 }
  0x4e   : > { %1871 = vmatprep.mubr.msk.bf16.mxu1 %vm362_vm1, %v2079_v15  ;;  %1861 = vmatprep.mubr.msk.bf16.mxu0 %vm362_vm1, %v1191_v48  ;;  %v1189_v15 = vsel %vm540_vm2, %v1187_v32, %v1188_v41 }
  0x4f   : > { %v1194_v38 = vpack.c.bf16 %v1189_v15, %v564_v61 }
  0x55   : > { %1872 = vmatmul.mubr.msk.bf16.vlgmr.msra.gmra.mrb[8].mxu1 %vm362_vm1, %v2086_v17  ;;  %1862 = vmatmul.mubr.msk.bf16.vlgmr.msra.gmra.mrb[0].mxu0 %vm362_vm1, %v1192_v2  ;;  %v1995_v17 = vmov 0.0  }
  0x56   : > { %1875 = vmatprep.mubr.msk.bf16.mxu1 %vm362_vm1, %v2100_v21  ;;  %1865 = vmatprep.mubr.msk.bf16.mxu0 %vm362_vm1, %v1193_v23  ;;  %1354 = vst [vmem:[%s2342_s24] sm:$0xff] %v1995_v17 }
  0x5d   : > { %1876 = vmatmul.mubr.msk.bf16.gmra.mrb[12].mxu1 %vm362_vm1, %v2134_v35  ;;  %1866 = vmatmul.mubr.msk.bf16.gmra.mrb[4].mxu0 %vm362_vm1, %v1194_v38 }
 0x118   : > { %v1813_v21 = vpop.f32.mrb[0].mxu1 }
 0x119   : > { %v722_v39 = vpop.f32.mrb[1].mxu1 }
 0x11a   : > { %v1814_v42 = vpop.f32.mrb[2].mxu1 }
 0x11b   : > { %v725_v47 = vpop.f32.mrb[3].mxu1 }
 0x120   : > { %v1817_v50 = vpop.f32.mrb[4].mxu1 }
 0x121   : > { %v738_v25 = vpop.f32.mrb[5].mxu1 }
 0x122   : > { %v1818_v43 = vpop.f32.mrb[6].mxu1 }
 0x123   : > { %v741_v52 = vpop.f32.mrb[7].mxu1 }
 0x128   : > { %v2346_v35 = vpop.f32.mrb[8].mxu1  ;;  %v1863_v53 = vpop.f32.mrb[0].mxu0 }
 0x129   : > { %v2348_v57 = vpop.f32.mrb[9].mxu1  ;;  %v2350_v58 = vadd.f32 %v1863_v53, %v1813_v21  ;;  %v1246_v59 = vpop.f32.mrb[1].mxu0 }
 0x12a   : > { %v2357_v62 = vpop.f32.mrb[10].mxu1  ;;  %v2359_v63 = vadd.f32 %v1246_v59, %v722_v39  ;;  %v1864_v0 = vpop.f32.mrb[2].mxu0 }
 0x12b   : > { %v1711_v1 = vpack.c.bf16 %v2357_v62, %v2346_v35  ;;  %v1326_v3 = vpop.f32.mrb[11].mxu1  ;;  %v2363_v4 = vadd.f32 %v1864_v0, %v1814_v42  ;;  %v1249_v45 = vpop.f32.mrb[3].mxu0 }
 0x12c   : > { %v1400_v46 = vadd.f32 %v1326_v3, %v2348_v57  ;;  %v1706_v56 = vpack.c.bf16 %v1326_v3, %v2348_v57  ;;  %v2373_v5 = vadd.f32 %v1249_v45, %v725_v47 }
 0x12d   : > { %1726 = vst [vmem:[%s2355_s28 + $0x8] sm:$0xff] %v1711_v1   ;;  %v1691_v6 = vpack.c.bf16 %v2363_v4, %v2350_v58 }
 0x12e   : > { %v1401_v55 = vadd.f32 %v2346_v35, %v1400_v46  ;;  %1707 = vst [vmem:[%s2355_s28] sm:$0xff] %v1706_v56   ;;  %v1355_v14 = vadd.f32 %v2373_v5, %v2359_v63  ;;  %v1686_v13 = vpack.c.bf16 %v2373_v5, %v2359_v63 }
 0x12f   : > { %1723 = vst [vmem:[%s2370_s30 + $0x8] sm:$0xff] %v1691_v6  }
 0x130   : > { %v1877_v16 = vpop.f32.mrb[12].mxu1  ;;  %v1402_v19 = vadd.f32 %v2357_v62, %v1401_v55  ;;  %v1356_v36 = vadd.f32 %v2350_v58, %v1355_v14  ;;  %1687 = vst [vmem:[%s2370_s30] sm:$0xff] %v1686_v13   ;;  %v1867_v24 = vpop.f32.mrb[4].mxu0 }
 0x131   : > { %v1339_v49 = vpop.f32.mrb[13].mxu1  ;;  %v1883_v26 = vadd.f32 %v1867_v24, %v1817_v50  ;;  %v1262_v54 = vpop.f32.mrb[5].mxu0 }
 0x132   : > { %v1403_v28 = vadd.f32 %v1402_v19, %v1339_v49  ;;  %v1878_v51 = vpop.f32.mrb[14].mxu1  ;;  %v1884_v7 = vadd.f32 %v1262_v54, %v738_v25  ;;  %v1357_v61 = vadd.f32 %v2363_v4, %v1356_v36  ;;  %v1868_v44 = vpop.f32.mrb[6].mxu0 }
 0x133   : > { %v1721_v8 = vpack.c.bf16 %v1878_v51, %v1877_v16  ;;  %v1342_v20 = vpop.f32.mrb[15].mxu1  ;;  %v1885_v29 = vadd.f32 %v1868_v44, %v1818_v43  ;;  %v1265_v34 = vpop.f32.mrb[7].mxu0 }
 0x134   : > { %v1404_v33 = vadd.f32 %v1403_v28, %v1342_v20  ;;  %v1716_v37 = vpack.c.bf16 %v1342_v20, %v1339_v49  ;;  %v1358_v31 = vadd.f32 %v1884_v7, %v1357_v61  ;;  %v1886_v27 = vadd.f32 %v1265_v34, %v741_v52 }
 0x135   : > { %1728 = vst [vmem:[%s2355_s28 + $0x18] sm:$0xff] %v1721_v8   ;;  %v1701_v9 = vpack.c.bf16 %v1885_v29, %v1883_v26 }
 0x136   : > { %v1405_v10 = vadd.f32 %v1877_v16, %v1404_v33  ;;  %1727 = vst [vmem:[%s2355_s28 + $0x10] sm:$0xff] %v1716_v37   ;;  %v1359_v30 = vadd.f32 %v1886_v27, %v1358_v31  ;;  %v1696_v40 = vpack.c.bf16 %v1886_v27, %v1884_v7 }
 0x137   : > { %1725 = vst [vmem:[%s2370_s30 + $0x18] sm:$0xff] %v1701_v9  }
 0x138   : > { %v1406_v11 = vadd.f32 %v1878_v51, %v1405_v10  ;;  %v1360_v12 = vadd.f32 %v1883_v26, %v1359_v30  ;;  %1724 = vst [vmem:[%s2370_s30 + $0x10] sm:$0xff] %v1696_v40  }
 0x13a   : > { %v1407_v48 = vrot.slane %v1406_v11, 4  ;;  %v1361_v60 = vadd.f32 %v1885_v29, %v1360_v12 }
 0x13c   : > { %v1408_v18 = vadd.f32 %v1407_v48, %v1406_v11  ;;  %v1362_v22 = vrot.slane %v1361_v60, 4 }
 0x13e   : > { %v1409_v2 = vrot.slane %v1408_v18, 2  ;;  %v1363_v32 = vadd.f32 %v1362_v22, %v1361_v60 }
 0x140   : > { %v1410_v23 = vadd.f32 %v1409_v2, %v1408_v18  ;;  %v1364_v41 = vrot.slane %v1363_v32, 2 }
 0x142   : > { %v1411_v15 = vrot.slane %v1410_v23, 1  ;;  %v1365_v38 = vadd.f32 %v1364_v41, %v1363_v32 }
 0x144   : > { %v1412_v17 = vadd.f32 %v1411_v15, %v1410_v23  ;;  %v1366_v21 = vrot.slane %v1365_v38, 1 }
 0x146   : > { %v1413_v39 = vmul.f32 0.015625, %v1412_v17  ;;  %1443 = vst [vmem:[%s2342_s24 + $0x2] sm:$0x1] %v1412_v17  ;;  %v1367_v42 = vadd.f32 %v1366_v21, %v1365_v38 }
 0x148   : > { %v1414_v47 = vsub.f32 %v2348_v57, %v1413_v39  ;;  %v1415_v50 = vsub.f32 %v1326_v3, %v1413_v39  ;;  %v1416_v25 = vsub.f32 %v2346_v35, %v1413_v39  ;;  %v1417_v43 = vsub.f32 %v2357_v62, %v1413_v39  ;;  %1398 = vst [vmem:[%s2342_s24] sm:$0x1] %v1367_v42 }
 0x149   : > { %v1368_v52 = vmul.f32 0.015625, %v1367_v42  ;;  %v1418_v53 = vsub.f32 %v1339_v49, %v1413_v39  ;;  %v1419_v59 = vsub.f32 %v1342_v20, %v1413_v39  ;;  %v1420_v0 = vsub.f32 %v1877_v16, %v1413_v39 }
 0x14a   : > { %v1421_v1 = vsub.f32 %v1878_v51, %v1413_v39  ;;  %v1422_v45 = vmul.f32 %v1414_v47, %v1414_v47  ;;  %v1423_v46 = vmul.f32 %v1415_v50, %v1415_v50  ;;  %v1424_v16 = vmul.f32 %v1416_v25, %v1416_v25 }
 0x14b   : > { %v1369_v56 = vsub.f32 %v2359_v63, %v1368_v52  ;;  %v1370_v6 = vsub.f32 %v2373_v5, %v1368_v52  ;;  %v1371_v55 = vsub.f32 %v2350_v58, %v1368_v52  ;;  %v1372_v57 = vsub.f32 %v2363_v4, %v1368_v52 }
 0x14c   : > { %v1373_v3 = vsub.f32 %v1884_v7, %v1368_v52  ;;  %v1374_v35 = vsub.f32 %v1886_v27, %v1368_v52  ;;  %v1375_v14 = vsub.f32 %v1883_v26, %v1368_v52  ;;  %v1376_v62 = vsub.f32 %v1885_v29, %v1368_v52 }
 0x14d   : > { %v1377_v13 = vmul.f32 %v1369_v56, %v1369_v56  ;;  %v1378_v19 = vmul.f32 %v1370_v6, %v1370_v6  ;;  %v1379_v36 = vmul.f32 %v1371_v55, %v1371_v55  ;;  %v1430_v49 = vadd.f32 %v1423_v46, %v1422_v45 }
 0x14e   : > { %v1380_v54 = vmul.f32 %v1372_v57, %v1372_v57  ;;  %v1425_v51 = vmul.f32 %v1417_v43, %v1417_v43  ;;  %v1381_v61 = vmul.f32 %v1373_v3, %v1373_v3  ;;  %v1426_v44 = vmul.f32 %v1418_v53, %v1418_v53 }
 0x14f   : > { %v1385_v24 = vadd.f32 %v1378_v19, %v1377_v13  ;;  %v1431_v63 = vadd.f32 %v1430_v49, %v1424_v16  ;;  %v1382_v8 = vmul.f32 %v1374_v35, %v1374_v35  ;;  %v1427_v7 = vmul.f32 %v1419_v59, %v1419_v59 }
 0x150   : > { %v1383_v26 = vmul.f32 %v1375_v14, %v1375_v14  ;;  %v1428_v34 = vmul.f32 %v1420_v0, %v1420_v0  ;;  %v1384_v37 = vmul.f32 %v1376_v62, %v1376_v62  ;;  %v1429_v27 = vmul.f32 %v1421_v1, %v1421_v1 }
 0x151   : > { %v1386_v28 = vadd.f32 %v1385_v24, %v1379_v36  ;;  %v1432_v58 = vadd.f32 %v1431_v63, %v1425_v51 }
 0x153   : > { %v1387_v5 = vadd.f32 %v1386_v28, %v1380_v54  ;;  %v1433_v20 = vadd.f32 %v1432_v58, %v1426_v44 }
 0x155   : > { %v1388_v4 = vadd.f32 %v1387_v5, %v1381_v61  ;;  %v1434_v33 = vadd.f32 %v1433_v20, %v1427_v7 }
 0x157   : > { %v1389_v29 = vadd.f32 %v1388_v4, %v1382_v8  ;;  %v1435_v9 = vadd.f32 %v1434_v33, %v1428_v34 }
 0x159   : > { %v1390_v31 = vadd.f32 %v1389_v29, %v1383_v26  ;;  %v1436_v30 = vadd.f32 %v1435_v9, %v1429_v27 }
 0x15b   : > { %v1391_v10 = vadd.f32 %v1390_v31, %v1384_v37  ;;  %v1437_v11 = vrot.slane %v1436_v30, 4 }
 0x15d   : > { %v1392_v40 = vrot.slane %v1391_v10, 4  ;;  %v1438_v48 = vadd.f32 %v1437_v11, %v1436_v30 }
 0x15f   : > { %v1393_v12 = vadd.f32 %v1392_v40, %v1391_v10  ;;  %v1439_v18 = vrot.slane %v1438_v48, 2 }
 0x161   : > { %v1394_v60 = vrot.slane %v1393_v12, 2  ;;  %v1440_v2 = vadd.f32 %v1439_v18, %v1438_v48 }
 0x163   : > { %v1395_v22 = vadd.f32 %v1394_v60, %v1393_v12  ;;  %v1441_v23 = vrot.slane %v1440_v2, 1 }
 0x165   : > { %v1396_v32 = vrot.slane %v1395_v22, 1  ;;  %v1442_v15 = vadd.f32 %v1441_v23, %v1440_v2 }
 0x167   : > { %v1397_v41 = vadd.f32 %v1396_v32, %v1395_v22  ;;  %1444 = vst [vmem:[%s2342_s24 + $0x3] sm:$0x1] %v1442_v15 }
 0x169   : > { %1399 = vst [vmem:[%s2342_s24 + $0x1] sm:$0x1] %v1397_v41 }
 0x16a PF: > { %s16_s18 = sadd.s32 1, %s1993_s18  }
 0x16b   : > { %p13_p4 = scmp.ge.s32.totalorder %s16_s18, 4  }
 0x16d   :  { %15 = sbr.rel (!%p13_p4) target bundleno = 1 (0x1), region = 94 }

// kernel: res_block_forward.4
= control target key start
LH: loop header
LB: loop body
LE: loop exit
PB: predicated region body
PF: predicated region fallthrough
CT: control target
= control target key end

     0   :  { %s2610_s15 = smov 0   ;;  %s3192_s0 = inlined_call_operand.vmem [shape: bf16[2,10,10,128], index: 0, kind: input, shape index: {}]   ;;  %s3193_s1 = inlined_call_operand.vmem [shape: f32[8,128], index: 1, kind: input, shape index: {}]   ;;  %s3194_s2 = inlined_call_operand.vmem [shape: bf16[9,128,128], index: 2, kind: input, shape index: {}]   ;;  %s3195_s3 = inlined_call_operand.vmem [shape: bf16[2,8,8,128], index: 3, kind: output, shape index: {0}]   ;;  %s3196_s4 = inlined_call_operand.vmem [shape: f32[2,8,128], index: 4, kind: output, shape index: {1}]  }
   0x1 LB: > { %s1817_s16 = sadd.s32 4294967295, %s2581_s15   ;;  %p1821_p0 = scmp.ge.s32.totalorder %s2581_s15, 1  ;;  %s2581_s15 = sphi %s2610_s15, %s15_s15  }
   0x2   : > { %p165_p1 = scmp.lt.s32.totalorder %s2581_s15, 3 }
   0x4   : > { %p166_p2 = pnand %p1821_p0, %p165_p1 }
   0x5   : > { %v2503_v0 = vld [vmem:[%s3194_s2 + $0x40] sm:$0xff] (!%p166_p2)   ;;  %p195_p3 = scmp.lt.s32.totalorder (!%p166_p2), %s1817_s16, 1  ;;  %v2505_v2 = vld [vmem:[%s3194_s2 + $0x48] sm:$0xff] (!%p166_p2)   ;;  %v2507_v4 = vld [vmem:[%s3194_s2 + $0x50] sm:$0xff] (!%p166_p2)   ;;  %v243_v5 = vlaneseq (!%p166_p2)  ;;  %v2583_v13 = vmov (!%p166_p2), 0.0   ;;  %vm363_vm2 = vcmask (!%p166_p2), 1046528  }
   0x6   : > { %169 = sbr.rel (%p166_p2) target bundleno = 444 (0x1bc), region = 32  ;;  %v2504_v1 = vld [vmem:[%s3194_s2 + $0x100] sm:$0xff] (!%p166_p2)   ;;  %2196 = vmatprep.subr.bf16.mxu1 (!%p166_p2), %v2503_v0  ;;  %v2506_v3 = vld [vmem:[%s3194_s2 + $0x108] sm:$0xff] (!%p166_p2)   ;;  %v2508_v6 = vld [vmem:[%s3194_s2 + $0x110] sm:$0xff] (!%p166_p2)   ;;  %v2682_v20 = vrot.slane (!%p166_p2), %v2583_v13, 1  ;;  %vm642_vm3 = vcmask (!%p166_p2), 1045504  }
   0x7   : > { %2292 = vmatprep.subr.bf16.mxu0 (!%p166_p2), %v2504_v1  ;;  %2197 = vmatpush3.bf16.msra.mxu1 (!%p166_p2), %v2503_v0  ;;  %v2509_v7 = vld [vmem:[%s3194_s2 + $0x58] sm:$0xff] (!%p166_p2)   ;;  %v2642_v8 = vshrl.u32 (!%p166_p2), %v243_v5, 7  ;;  %v2511_v11 = vld [vmem:[%s3194_s2 + $0x60] sm:$0xff] (!%p166_p2)   ;;  %v2513_v16 = vld [vmem:[%s3194_s2 + $0x68] sm:$0xff] (!%p166_p2)   ;;  %vm2584_vm4 = vmmov (!%p166_p2), 1  }
   0x8   : > { %2293 = vmatpush3.bf16.msra.mxu0 (!%p166_p2), %v2504_v1  ;;  %2198 = vmatprep.subr.bf16.mxu1 (!%p166_p2), %v2505_v2  ;;  %v2510_v9 = vld [vmem:[%s3194_s2 + $0x118] sm:$0xff] (!%p166_p2)   ;;  %v2512_v14 = vld [vmem:[%s3194_s2 + $0x120] sm:$0xff] (!%p166_p2)   ;;  %v2514_v21 = vld [vmem:[%s3194_s2 + $0x128] sm:$0xff] (!%p166_p2)  }
   0x9   : > { %2294 = vmatprep.subr.bf16.mxu0 (!%p166_p2), %v2506_v3  ;;  %v2654_v10 = vadd.s32 (!%p166_p2), 8, %v2642_v8  ;;  %v245_v12 = vsub.s32 (!%p166_p2), 0, %v2642_v8  ;;  %v265_v15 = vsub.s32 (!%p166_p2), 1, %v2642_v8  ;;  %vm302_vm0 = vcmp.ge.s32.totalorder (!%p166_p2), %v2642_v8, 1  ;;  %v210_v17 = vld [vmem:[%s3193_s1] sm:$0xff] (!%p166_p2)  ;;  %v2515_v30 = vld [vmem:[%s3194_s2 + $0x70] sm:$0xff] (!%p166_p2)  }
   0xa   : > { %v2516_v39 = vld [vmem:[%s3194_s2 + $0x130] sm:$0xff] (!%p166_p2)   ;;  %v2517_v48 = vld [vmem:[%s3194_s2 + $0x78] sm:$0xff] (!%p166_p2)   ;;  %v2519_v5 = vld [vmem:[%s3194_s2] sm:$0xff] (!%p166_p2)  }
   0xb   : > { %2199 = vmatpush3.bf16.msra.mxu1 (!%p166_p2), %v2505_v2  ;;  %vm305_vm1 = vcmp.le.s32.totalorder (!%p166_p2), %v2654_v10, 8  ;;  %v2687_v24 = vrot.slane (!%p166_p2), %v210_v17, %v245_v12  ;;  %v2689_v25 = vrot.slane (!%p166_p2), %v210_v17, %v265_v15  ;;  %v2518_v53 = vld [vmem:[%s3194_s2 + $0x138] sm:$0xff] (!%p166_p2)   ;;  %vm2894_vm5 = vmpackc.low (!%p166_p2), %vm302_vm0, %vm2584_vm4  ;;  %v2560_v8 = vld [vmem:[%s3194_s2 + $0x1e0] sm:$0xff] (!%p166_p2)  }
   0xc   : > { %2295 = vmatpush3.bf16.msra.mxu0 (!%p166_p2), %v2506_v3  ;;  %2200 = vmatprep.subr.bf16.mxu1 (!%p166_p2), %v2507_v4  ;;  %vm2973_vm6 = vmpackc.low (!%p166_p2), %vm302_vm0, %vm302_vm0 }
   0xd   : > { %s3202_s16 = smov (!%p195_p3, %s1817_s16), 1  ;;  %2296 = vmatprep.subr.bf16.mxu0 %v2508_v6  ;;  %vm2011_vm7 = vmpackc.low %vm2584_vm4, %vm302_vm0 }
   0xe   : > { %s1825_s29 = sshll.u32 %s3202_s16, 3  ;;  %s2492_s8 = smul.u32 80, %s3202_s16 }
   0xf   : > { %s2651_s11 = scalar_lea.vmem %s3196_s4, %s1825_s29  ;;  %2201 = vmatpush3.bf16.msra.mxu1 %v2507_v4  ;;  %s2064_s6 = sshll.u32 %s3202_s16, 5 }
  0x10   : > { %2297 = vmatpush3.bf16.msra.mxu0 %v2508_v6  ;;  %2202 = vmatprep.subr.bf16.mxu1 %v2509_v7  ;;  %1669 = vst [vmem:[%s2651_s11] sm:$0xff] %v2583_v13  ;;  %s2668_s20 = scalar_lea.vmem %s3192_s0, %s2492_s8  ;;  %s204_s9 = scalar_lea.vmem %s3195_s3, %s2064_s6 }
  0x11   : > { %2298 = vmatprep.subr.bf16.mxu0 %v2510_v9  ;;  %v211_v18 = vld [vmem:[%s2668_s20 + $0x8] ss:$8 sps:$4 sm:$0xff]   ;;  %v212_v19 = vld [vmem:[%s2668_s20 + $0xc] sm:$0x1]  ;;  %v214_v26 = vld [vmem:[%s2668_s20 + $0x14] sm:$0x1] }
  0x12   : > { %v227_v22 = vunpack.c.l.bf16 %v211_v18  ;;  %v228_v23 = vunpack.c.l.bf16 %v212_v19  ;;  %v215_v27 = vld [vmem:[%s2668_s20 + $0x18] ss:$8 sps:$4 sm:$0xff]   ;;  %v216_v28 = vld [vmem:[%s2668_s20 + $0x1c] sm:$0x1]  ;;  %v229_v29 = vunpack.c.h.bf16 %v211_v18  ;;  %v230_v33 = vunpack.c.l.bf16 %v214_v26  ;;  %v218_v37 = vld [vmem:[%s2668_s20 + $0x24] sm:$0x1] }
  0x13   : > { %2203 = vmatpush3.bf16.msra.mxu1 %v2509_v7  ;;  %v231_v34 = vunpack.c.l.bf16 %v215_v27  ;;  %v232_v35 = vunpack.c.l.bf16 %v216_v28  ;;  %v233_v38 = vunpack.c.h.bf16 %v215_v27  ;;  %v234_v46 = vunpack.c.l.bf16 %v218_v37  ;;  %v2521_v27 = vld [vmem:[%s3194_s2 + $0x8] sm:$0xff]   ;;  %v2523_v37 = vld [vmem:[%s3194_s2 + $0x10] sm:$0xff]  }
  0x14   : > { %2299 = vmatpush3.bf16.msra.mxu0 %v2510_v9  ;;  %2204 = vmatprep.subr.bf16.mxu1 %v2511_v11  ;;  %v247_v31 = vmul.f32 %v2687_v24, %v227_v22  ;;  %v248_v32 = vmul.f32 %v2687_v24, %v228_v23  ;;  %v249_v36 = vmul.f32 %v2687_v24, %v229_v29  ;;  %v219_v28 = vld [vmem:[%s2668_s20 + $0x28] ss:$8 sps:$4 sm:$0xff]  }
  0x15   : > { %2300 = vmatprep.subr.bf16.mxu0 %v2512_v14  ;;  %v250_v42 = vmul.f32 %v2687_v24, %v230_v33  ;;  %v251_v43 = vmul.f32 %v2687_v24, %v231_v34  ;;  %v252_v44 = vmul.f32 %v2687_v24, %v232_v35  ;;  %v253_v47 = vmul.f32 %v2687_v24, %v233_v38  ;;  %v222_v35 = vld [vmem:[%s2668_s20 + $0x34] sm:$0x1] }
  0x16   : > { %v267_v40 = vadd.f32 %v2689_v25, %v247_v31  ;;  %v268_v41 = vadd.f32 %v2689_v25, %v248_v32  ;;  %v269_v45 = vadd.f32 %v2689_v25, %v249_v36  ;;  %v254_v62 = vmul.f32 %v2687_v24, %v234_v46 }
  0x17   : > { %2205 = vmatpush3.bf16.msra.mxu1 %v2511_v11  ;;  %v270_v51 = vadd.f32 %v2689_v25, %v250_v42  ;;  %v271_v52 = vadd.f32 %v2689_v25, %v251_v43  ;;  %v272_v54 = vadd.f32 %v2689_v25, %v252_v44  ;;  %v273_v63 = vadd.f32 %v2689_v25, %v253_v47  ;;  %v223_v44 = vld [vmem:[%s2668_s20 + $0x38] ss:$8 sps:$4 sm:$0xff]  }
  0x18   : > { %2301 = vmatpush3.bf16.msra.mxu0 %v2512_v14  ;;  %2206 = vmatprep.subr.bf16.mxu1 %v2513_v16  ;;  %v2714_v49 = vmax.f32 %v267_v40, 0.0  ;;  %v284_v50 = vmax.f32 %v268_v41, 0.0  ;;  %v2722_v55 = vmax.f32 %v269_v45, 0.0  ;;  %v2520_v14 = vld [vmem:[%s3194_s2 + $0x140] sm:$0xff]   ;;  %v274_v18 = vadd.f32 %v2689_v25, %v254_v62  ;;  %v224_v45 = vld [vmem:[%s2668_s20 + $0x3c] sm:$0x1] }
  0x19   : > { %2302 = vmatprep.subr.bf16.mxu0 %v2514_v21  ;;  %v286_v58 = vmax.f32 %v270_v51, 0.0  ;;  %v2733_v59 = vmax.f32 %v271_v52, 0.0  ;;  %v288_v0 = vmax.f32 %v272_v54, 0.0  ;;  %v2771_v19 = vmax.f32 %v273_v63, 0.0  ;;  %v226_v51 = vld [vmem:[%s2668_s20 + $0x44] sm:$0x1] }
  0x1a   : > { %v2727_v56 = vsel %vm302_vm0, %v2714_v49, 0.0  ;;  %v2731_v57 = vsel %vm305_vm1, %v284_v50, 0.0  ;;  %v2742_v1 = vsel %vm302_vm0, %v2722_v55, 0.0  ;;  %v290_v23 = vmax.f32 %v274_v18, 0.0 }
  0x1b   : > { %2207 = vmatpush3.bf16.msra.mxu1 %v2513_v16  ;;  %v366_v60 = vrot.slane %v2727_v56, 1  ;;  %v367_v61 = vrot.slane %v2731_v57, 1  ;;  %v2746_v2 = vsel %vm305_vm1, %v286_v58, 0.0  ;;  %v2751_v3 = vsel %vm302_vm0, %v2733_v59, 0.0 }
  0x1c   : > { %2303 = vmatpush3.bf16.msra.mxu0 %v2514_v21  ;;  %2208 = vmatprep.subr.bf16.mxu1 %v2515_v30  ;;  %v369_v6 = vrot.slane %v2742_v1, 1  ;;  %v370_v7 = vrot.slane %v2746_v2, 1  ;;  %v372_v9 = vrot.slane %v2751_v3, 1  ;;  %v2763_v12 = vsel %vm305_vm1, %v288_v0, 0.0 }
  0x1d   : > { %2304 = vmatprep.subr.bf16.mxu0 %v2516_v39  ;;  %v368_v4 = vsel %vm363_vm2, %v366_v60, %v367_v61  ;;  %v373_v16 = vrot.slane %v2763_v12, 1  ;;  %v2779_v26 = vsel %vm302_vm0, %v2771_v19, 0.0  ;;  %v235_v31 = vunpack.c.l.bf16 %v219_v28  ;;  %v2525_v61 = vld [vmem:[%s3194_s2 + $0x18] sm:$0xff]  }
  0x1e   : > { %v395_v11 = vpack.c.bf16 %v368_v4, %v2682_v20  ;;  %v371_v15 = vsel %vm363_vm2, %v369_v6, %v370_v7  ;;  %v375_v29 = vrot.slane %v2779_v26, 1  ;;  %v237_v32 = vunpack.c.h.bf16 %v219_v28 }
  0x1f   : > { %2209 = vmatpush3.bf16.msra.mxu1 %v2515_v30  ;;  %v964_v17 = vpack.c.bf16 %v371_v15, %v368_v4  ;;  %v374_v21 = vsel %vm363_vm2, %v372_v9, %v373_v16  ;;  %v220_v30 = vld [vmem:[%s2668_s20 + $0x2c] sm:$0x1]  ;;  %v2790_v33 = vsel %vm305_vm1, %v290_v23, 0.0  ;;  %v255_v38 = vmul.f32 %v2687_v24, %v235_v31 }
  0x20   : > { %2305 = vmatpush3.bf16.msra.mxu0 %v2516_v39  ;;  %2210 = vmatprep.subr.bf16.mxu1 %v2517_v48  ;;  %v2774_v22 = vpack.c.bf16 %v374_v21, %v371_v15  ;;  %v236_v34 = vunpack.c.l.bf16 %v220_v30  ;;  %v376_v36 = vrot.slane %v2790_v33, 1  ;;  %v238_v39 = vunpack.c.l.bf16 %v222_v35 }
  0x21   : > { %2306 = vmatprep.subr.bf16.mxu0 %v2518_v53  ;;  %2212 = vmatprep.mubr.bf16.mxu1 %v395_v11  ;;  %v645_v40 = vrot.slane %v2727_v56, 2  ;;  %v646_v41 = vrot.slane %v2731_v57, 2  ;;  %v257_v43 = vmul.f32 %v2687_v24, %v237_v32  ;;  %v275_v47 = vadd.f32 %v2689_v25, %v255_v38  ;;  %v2524_v11 = vld [vmem:[%s3194_s2 + $0x150] sm:$0xff]  }
  0x22   : > { %2308 = vmatprep.mubr.bf16.mxu0 %v964_v17  ;;  %v256_v42 = vmul.f32 %v2687_v24, %v236_v34  ;;  %v377_v46 = vsel %vm363_vm2, %v375_v29, %v376_v36  ;;  %v239_v50 = vunpack.c.l.bf16 %v223_v44  ;;  %v240_v60 = vunpack.c.l.bf16 %v224_v45 }
  0x23   : > { %2211 = vmatpush3.bf16.msra.mxu1 %v2517_v48  ;;  %v258_v48 = vmul.f32 %v2687_v24, %v238_v39  ;;  %v965_v52 = vpack.c.bf16 %v377_v46, %v374_v21  ;;  %v277_v58 = vadd.f32 %v2689_v25, %v257_v43  ;;  %v2816_v62 = vmax.f32 %v275_v47, 0.0  ;;  %v2526_v43 = vld [vmem:[%s3194_s2 + $0x158] sm:$0xff]  }
  0x24   : > { %2307 = vmatpush3.bf16.msra.mxu0 %v2518_v53  ;;  %2220 = vmatprep.subr.bf16.mxu1 %v2519_v5  ;;  %v2522_v53 = vld [vmem:[%s3194_s2 + $0x148] sm:$0xff]   ;;  %v276_v54 = vadd.f32 %v2689_v25, %v256_v42  ;;  %v259_v0 = vmul.f32 %v2687_v24, %v239_v50  ;;  %v241_v4 = vunpack.c.h.bf16 %v223_v44  ;;  %v260_v7 = vmul.f32 %v2687_v24, %v240_v60 }
  0x25   : > { %2316 = vmatprep.subr.bf16.mxu0 %v2520_v14  ;;  %v278_v63 = vadd.f32 %v2689_v25, %v258_v48  ;;  %v2820_v6 = vmax.f32 %v277_v58, 0.0  ;;  %v242_v9 = vunpack.c.l.bf16 %v226_v51  ;;  %v2829_v15 = vsel %vm302_vm0, %v2816_v62, 0.0 }
  0x26   : > { %2213 = vmatmul.mubr.bf16.vlgmr.msra.gmra.mrb[0].mxu1 %v2774_v22  ;;  %v279_v17 = vadd.f32 %v2689_v25, %v259_v0  ;;  %v261_v18 = vmul.f32 %v2687_v24, %v241_v4  ;;  %v378_v23 = vrot.slane %v2829_v15, 1  ;;  %v280_v28 = vadd.f32 %v2689_v25, %v260_v7 }
  0x27   : > { %2221 = vmatpush3.bf16.msra.mxu1 %v2519_v5  ;;  %2309 = vmatmul.mubr.bf16.vlgmr.msra.gmra.mrb[0].mxu0 %v965_v52  ;;  %v292_v5 = vmax.f32 %v276_v54, 0.0  ;;  %v294_v16 = vmax.f32 %v278_v63, 0.0  ;;  %v262_v36 = vmul.f32 %v2687_v24, %v242_v9  ;;  %v649_v52 = vrot.slane %v2746_v2, 2 }
  0x28   : > { %2222 = vmatprep.subr.bf16.mxu1 %v2521_v27  ;;  %2317 = vmatpush3.bf16.msra.mxu0 %v2520_v14  ;;  %v2527_v14 = vld [vmem:[%s3194_s2 + $0x20] sm:$0xff]   ;;  %v2853_v32 = vmax.f32 %v279_v17, 0.0  ;;  %v296_v35 = vmax.f32 %v280_v28, 0.0  ;;  %v281_v38 = vadd.f32 %v2689_v25, %v261_v18  ;;  %v1859_v60 = vpack.c.bf16 %v2714_v49, %v2583_v13  ;;  %v2530_v18 = vld [vmem:[%s3194_s2 + $0x168] sm:$0xff]  }
  0x29   : > { %2318 = vmatprep.subr.bf16.mxu0 %v2522_v53  ;;  %v2838_v21 = vsel %vm305_vm1, %v292_v5, 0.0  ;;  %v2850_v30 = vsel %vm305_vm1, %v294_v16, 0.0  ;;  %v282_v50 = vadd.f32 %v2689_v25, %v262_v36  ;;  %v1922_v4 = vpack.c.bf16 %v2771_v19, %v2733_v59 }
  0x2a   : > { %v379_v29 = vrot.slane %v2838_v21, 1  ;;  %v382_v34 = vrot.slane %v2850_v30, 1  ;;  %v2863_v42 = vsel %vm302_vm0, %v2853_v32, 0.0  ;;  %v2878_v51 = vmax.f32 %v281_v38, 0.0 }
  0x2b   : > { %2223 = vmatpush3.bf16.msra.mxu1 %v2521_v27  ;;  %v2844_v27 = vsel %vm302_vm0, %v2820_v6, 0.0  ;;  %v384_v45 = vrot.slane %v2863_v42, 1  ;;  %v298_v58 = vmax.f32 %v282_v50, 0.0  ;;  %v1925_v5 = vpack.c.bf16 %v2820_v6, %v2816_v62 }
  0x2c   : > { %2224 = vmatprep.subr.bf16.mxu1 %v2523_v37  ;;  %v381_v31 = vrot.slane %v2844_v27, 1  ;;  %2319 = vmatpush3.bf16.msra.mxu0 %v2522_v53  ;;  %v380_v39 = vsel %vm363_vm2, %v378_v23, %v379_v29  ;;  %v1919_v53 = vpack.c.bf16 %v2722_v55, %v2714_v49  ;;  %v326_v25 = vsel %vm302_vm0, %v2878_v51, 0.0  ;;  %v2558_v49 = vld [vmem:[%s3194_s2 + $0x1d8] sm:$0xff]  }
  0x2d   : > { %2320 = vmatprep.subr.bf16.mxu0 %v2524_v11  ;;  %v2868_v44 = vpack.c.bf16 %v380_v39, %v377_v46  ;;  %v2529_v46 = vld [vmem:[%s3194_s2 + $0x28] sm:$0xff]   ;;  %v960_v0 = vrot.slane %v326_v25, 1  ;;  %v327_v7 = vsel %vm305_vm1, %v298_v58, 0.0  ;;  %v1928_v9 = vpack.c.bf16 %v2878_v51, %v2853_v32 }
  0x2e   : > { %v383_v24 = vsel %vm363_vm2, %v381_v31, %v382_v34  ;;  %v961_v16 = vrot.slane %v327_v7, 1  ;;  %v2922_v17 = vsel %vm642_vm3, %v645_v40, %v646_v41  ;;  %v2533_v40 = vld [vmem:[%s3194_s2 + $0x38] sm:$0xff]   ;;  %v2942_v41 = vrot.slane %v2583_v13, 2  ;;  %v2532_v34 = vld [vmem:[%s3194_s2 + $0x170] sm:$0xff]  }
  0x2f   : > { %2225 = vmatpush3.bf16.msra.mxu1 %v2523_v37  ;;  %v648_v37 = vrot.slane %v2742_v1, 2  ;;  %v2873_v1 = vsel %vm305_vm1, %v296_v35, 0.0  ;;  %v966_v47 = vpack.c.bf16 %v383_v24, %v380_v39  ;;  %2216 = vmatprep.mubr.bf16.mxu1 %v2868_v44  ;;  %v1106_v23 = vrot.slane %v326_v25, 2  ;;  %v2534_v39 = vld [vmem:[%s3194_s2 + $0x178] sm:$0xff]  }
  0x30   : > { %2226 = vmatprep.subr.bf16.mxu1 %v2525_v61  ;;  %v385_v48 = vrot.slane %v2873_v1, 1  ;;  %2321 = vmatpush3.bf16.msra.mxu0 %v2524_v11  ;;  %v2531_v11 = vld [vmem:[%s3194_s2 + $0x30] sm:$0xff]   ;;  %v1107_v28 = vrot.slane %v327_v7, 2  ;;  %v651_v31 = vrot.slane %v2751_v3, 2  ;;  %v652_v36 = vrot.slane %v2763_v12, 2 }
  0x31   : > { %2312 = vmatprep.mubr.bf16.mxu0 %v966_v47  ;;  %2322 = vmatprep.subr.bf16.mxu0 %v2526_v43  ;;  %v2925_v10 = vsel %vm642_vm3, %v648_v37, %v649_v52  ;;  %v654_v38 = vrot.slane %v2779_v26, 2  ;;  %v655_v3 = vrot.slane %v2790_v33, 2  ;;  %v657_v12 = vrot.slane %v2829_v15, 2  ;;  %v2540_v7 = vld [vmem:[%s3194_s2 + $0x190] sm:$0xff]  }
  0x32   : > { %v386_v54 = vsel %vm363_vm2, %v384_v45, %v385_v48  ;;  %v1110_v57 = vpack.c.bf16 %v2925_v10, %v2922_v17  ;;  %v2951_v35 = vsel %vm642_vm3, %v1106_v23, %v1107_v28  ;;  %v658_v26 = vrot.slane %v2838_v21, 2  ;;  %v2537_v21 = vld [vmem:[%s3194_s2 + $0x88] sm:$0xff]   ;;  %v2536_v48 = vld [vmem:[%s3194_s2 + $0x180] sm:$0xff]   ;;  %v2549_v23 = vld [vmem:[%s3194_s2 + $0xb8] sm:$0xff]  }
  0x33   : > { %2227 = vmatpush3.bf16.msra.mxu1 %v2525_v61  ;;  %v2528_v61 = vld [vmem:[%s3194_s2 + $0x160] sm:$0xff]   ;;  %v2903_v63 = vpack.c.bf16 %v386_v54, %v383_v24  ;;  %v1530_v37 = vpack.c.bf16 %v2942_v41, %v2951_v35  ;;  %v1862_v24 = vpack.c.bf16 %v2733_v59, %v2722_v55  ;;  %v660_v33 = vrot.slane %v2844_v27, 2  ;;  %v2548_v28 = vld [vmem:[%s3194_s2 + $0x1b0] sm:$0xff]   ;;  %v2561_v55 = vld [vmem:[%s3194_s2 + $0xe8] sm:$0xff]  }
  0x34   : > { %2228 = vmatprep.subr.bf16.mxu1 %v2527_v14  ;;  %2323 = vmatpush3.bf16.msra.mxu0 %v2526_v43  ;;  %v2535_v43 = vld [vmem:[%s3194_s2 + $0x80] sm:$0xff]   ;;  %v661_v45 = vrot.slane %v2850_v30, 2  ;;  %v2979_v15 = vpack.c.bf16 %v2816_v62, %v2771_v19  ;;  %v653_v27 = vsel %vm642_vm3, %v651_v31, %v652_v36  ;;  %v2986_v30 = vsel %vm642_vm3, %v654_v38, %v655_v3  ;;  %v2550_v36 = vld [vmem:[%s3194_s2 + $0x1b8] sm:$0xff]   ;;  %v2553_v3 = vld [vmem:[%s3194_s2 + $0xc8] sm:$0xff]  }
  0x35   : > { %2217 = vmatmul.mubr.bf16.gmra.mrb[4].mxu1 %v2903_v63  ;;  %2324 = vmatprep.subr.bf16.mxu0 %v2528_v61  ;;  %v659_v50 = vsel %vm642_vm3, %v657_v12, %v658_v26  ;;  %v663_v25 = vrot.slane %v2863_v42, 2  ;;  %v664_v2 = vrot.slane %v2873_v1, 2  ;;  %v2541_v42 = vld [vmem:[%s3194_s2 + $0x98] sm:$0xff]   ;;  %v2551_v31 = vld [vmem:[%s3194_s2 + $0xc0] sm:$0xff]   ;;  %v2572_v62 = vld [vmem:[%s3194_s2 + $0x228] sm:$0xff]  }
  0x36   : > { %2236 = vmatprep.mubr.msk.bf16.mxu1 %vm2894_vm5, %v1859_v60  ;;  %v2995_v52 = vsel %vm642_vm3, %v660_v33, %v661_v45  ;;  %v2538_v60 = vld [vmem:[%s3194_s2 + $0x188] sm:$0xff]   ;;  %v3063_v38 = vpack.c.bf16 %v659_v50, %v2986_v30  ;;  %v2557_v26 = vld [vmem:[%s3194_s2 + $0xd8] sm:$0xff]   ;;  %v2559_v33 = vld [vmem:[%s3194_s2 + $0xe0] sm:$0xff]   ;;  %v2012_v45 = vpack.c.bf16 %v2583_v13, %v2878_v51 }
  0x37   : > { %2229 = vmatpush3.bf16.msra.mxu1 %v2527_v14  ;;  %v2933_v14 = vsel %vm363_vm2, %v960_v0, %v961_v16  ;;  %v1112_v58 = vpack.c.bf16 %v2995_v52, %v659_v50  ;;  %v674_v0 = vpack.c.bf16 %v2922_v17, %v2942_v41  ;;  %v665_v1 = vsel %vm642_vm3, %v663_v25, %v664_v2  ;;  %v2542_v17 = vld [vmem:[%s3194_s2 + $0x198] sm:$0xff]   ;;  %v2563_v13 = vld [vmem:[%s3194_s2 + $0xf0] sm:$0xff]   ;;  %v2571_v19 = vld [vmem:[%s3194_s2 + $0x220] sm:$0xff]  }
  0x38   : > { %2230 = vmatprep.subr.bf16.mxu1 %v2529_v46  ;;  %v967_v56 = vpack.c.bf16 %v2933_v14, %v386_v54  ;;  %2325 = vmatpush3.bf16.msra.mxu0 %v2528_v61  ;;  %v1391_v29 = vpack.c.bf16 %v2682_v20, %v2933_v14  ;;  %v2539_v54 = vld [vmem:[%s3194_s2 + $0x90] sm:$0xff]   ;;  %v3012_v61 = vpack.c.bf16 %v2853_v32, %v2820_v6  ;;  %v2570_v59 = vld [vmem:[%s3194_s2 + $0x218] sm:$0xff]  }
  0x39   : > { %2326 = vmatprep.subr.bf16.mxu0 %v2530_v18  ;;  %v1113_v16 = vpack.c.bf16 %v2951_v35, %v665_v1  ;;  %v3080_v12 = vpack.c.bf16 %v665_v1, %v2995_v52  ;;  %v2573_v6 = vld [vmem:[%s3194_s2 + $0x230] sm:$0xff]   ;;  %v2574_v20 = vld [vmem:[%s3194_s2 + $0x238] sm:$0xff]  }
  0x3a   : > { %2313 = vmatmul.mubr.bf16.gmra.mrb[4].mxu0 %v967_v56  ;;  %v2544_v56 = vld [vmem:[%s3194_s2 + $0x1a0] sm:$0xff]  }
  0x3b   : > { %2231 = vmatpush3.bf16.msra.mxu1 %v2529_v46  ;;  %2332 = vmatprep.mubr.bf16.mxu0 %v1110_v57  ;;  %v1111_v46 = vpack.c.bf16 %v2986_v30, %v653_v27  ;;  %v2547_v57 = vld [vmem:[%s3194_s2 + $0xb0] sm:$0xff]   ;;  %v2568_v30 = vld [vmem:[%s3194_s2 + $0x208] sm:$0xff]  }
  0x3c   : > { %2232 = vmatprep.subr.bf16.mxu1 %v2531_v11  ;;  %2327 = vmatpush3.bf16.msra.mxu0 %v2530_v18  ;;  %v2545_v18 = vld [vmem:[%s3194_s2 + $0xa8] sm:$0xff]  }
  0x3d   : > { %2328 = vmatprep.subr.bf16.mxu0 %v2532_v34 }
  0x3f   : > { %2233 = vmatpush3.bf16.msra.mxu1 %v2531_v11  ;;  %v2543_v11 = vld [vmem:[%s3194_s2 + $0xa0] sm:$0xff]  }
  0x40   : > { %2234 = vmatprep.subr.bf16.mxu1 %v2533_v40  ;;  %2329 = vmatpush3.bf16.msra.mxu0 %v2532_v34  ;;  %v3057_v34 = vpack.c.bf16 %v653_v27, %v2925_v10  ;;  %v2552_v10 = vld [vmem:[%s3194_s2 + $0x1c0] sm:$0xff]   ;;  %v2566_v27 = vld [vmem:[%s3194_s2 + $0x1f8] sm:$0xff]  }
  0x41   : > { %2330 = vmatprep.subr.bf16.mxu0 %v2534_v39 }
  0x43   : > { %2235 = vmatpush3.bf16.msra.mxu1 %v2533_v40  ;;  %v2546_v40 = vld [vmem:[%s3194_s2 + $0x1a8] sm:$0xff]  }
  0x44   : > { %2244 = vmatprep.subr.bf16.mxu1 %v2535_v43  ;;  %2331 = vmatpush3.bf16.msra.mxu0 %v2534_v39  ;;  %v2555_v39 = vld [vmem:[%s3194_s2 + $0xd0] sm:$0xff]  }
  0x45   : > { %2340 = vmatprep.subr.bf16.mxu0 %v2536_v48 }
  0x46   : > { %2237 = vmatmul.mubr.msk.bf16.vlgmr.msra.gmra.mrb[0].mxu1 %vm2973_vm6, %v1862_v24 }
  0x47   : > { %2245 = vmatpush3.bf16.msra.mxu1 %v2535_v43  ;;  %2240 = vmatprep.mubr.msk.bf16.mxu1 %vm2973_vm6, %v2979_v15  ;;  %v2554_v43 = vld [vmem:[%s3194_s2 + $0x1c8] sm:$0xff]  }
  0x48   : > { %2246 = vmatprep.subr.bf16.mxu1 %v2537_v21  ;;  %2333 = vmatmul.mubr.bf16.vlgmr.msra.gmra.mrb[0].mxu0 %v1111_v46 }
  0x49   : > { %2341 = vmatpush3.bf16.msra.mxu0 %v2536_v48  ;;  %2336 = vmatprep.mubr.bf16.mxu0 %v1112_v58  ;;  %v2569_v48 = vld [vmem:[%s3194_s2 + $0x210] sm:$0xff]  }
  0x4a   : > { %2342 = vmatprep.subr.bf16.mxu0 %v2538_v60 }
  0x4b   : > { %2247 = vmatpush3.bf16.msra.mxu1 %v2537_v21  ;;  %v2567_v21 = vld [vmem:[%s3194_s2 + $0x200] sm:$0xff]  }
  0x4c   : > { %2248 = vmatprep.subr.bf16.mxu1 %v2539_v54 }
  0x4d   : > { %2343 = vmatpush3.bf16.msra.mxu0 %v2538_v60 }
  0x4e   : > { %2241 = vmatmul.mubr.msk.bf16.gmra.mrb[4].mxu1 %vm2973_vm6, %v3012_v61  ;;  %2344 = vmatprep.subr.bf16.mxu0 %v2540_v7 }
  0x4f   : > { %2249 = vmatpush3.bf16.msra.mxu1 %v2539_v54  ;;  %2260 = vmatprep.mubr.bf16.mxu1 %v674_v0 }
  0x50   : > { %2250 = vmatprep.subr.bf16.mxu1 %v2541_v42  ;;  %2337 = vmatmul.mubr.bf16.gmra.mrb[4].mxu0 %v1113_v16 }
  0x51   : > { %2345 = vmatpush3.bf16.msra.mxu0 %v2540_v7  ;;  %2356 = vmatprep.mubr.msk.bf16.mxu0 %vm2973_vm6, %v1862_v24  ;;  %v2556_v24 = vld [vmem:[%s3194_s2 + $0x1d0] sm:$0xff]  }
  0x52   : > { %2346 = vmatprep.subr.bf16.mxu0 %v2542_v17 }
  0x53   : > { %2251 = vmatpush3.bf16.msra.mxu1 %v2541_v42 }
  0x54   : > { %2252 = vmatprep.subr.bf16.mxu1 %v2543_v11 }
  0x55   : > { %2347 = vmatpush3.bf16.msra.mxu0 %v2542_v17 }
  0x56   : > { %2348 = vmatprep.subr.bf16.mxu0 %v2544_v56 }
  0x57   : > { %2253 = vmatpush3.bf16.msra.mxu1 %v2543_v11 }
  0x58   : > { %2254 = vmatprep.subr.bf16.mxu1 %v2545_v18 }
  0x59   : > { %2349 = vmatpush3.bf16.msra.mxu0 %v2544_v56 }
  0x5a   : > { %2350 = vmatprep.subr.bf16.mxu0 %v2546_v40 }
  0x5b   : > { %2255 = vmatpush3.bf16.msra.mxu1 %v2545_v18 }
  0x5c   : > { %2256 = vmatprep.subr.bf16.mxu1 %v2547_v57 }
  0x5d   : > { %2351 = vmatpush3.bf16.msra.mxu0 %v2546_v40 }
  0x5e   : > { %2352 = vmatprep.subr.bf16.mxu0 %v2548_v28 }
  0x5f   : > { %2257 = vmatpush3.bf16.msra.mxu1 %v2547_v57 }
  0x60   : > { %2258 = vmatprep.subr.bf16.mxu1 %v2549_v23 }
  0x61   : > { %2353 = vmatpush3.bf16.msra.mxu0 %v2548_v28 }
  0x62   : > { %2354 = vmatprep.subr.bf16.mxu0 %v2550_v36 }
  0x63   : > { %2259 = vmatpush3.bf16.msra.mxu1 %v2549_v23 }
  0x64   : > { %2268 = vmatprep.subr.bf16.mxu1 %v2551_v31 }
  0x65   : > { %2355 = vmatpush3.bf16.msra.mxu0 %v2550_v36 }
  0x66   : > { %2261 = vmatmul.mubr.bf16.vlgmr.msra.gmra.mrb[0].mxu1 %v3057_v34  ;;  %2364 = vmatprep.subr.bf16.mxu0 %v2552_v10 }
  0x67   : > { %2269 = vmatpush3.bf16.msra.mxu1 %v2551_v31  ;;  %2264 = vmatprep.mubr.bf16.mxu1 %v3063_v38 }
  0x68   : > { %2270 = vmatprep.subr.bf16.mxu1 %v2553_v3  ;;  %2357 = vmatmul.mubr.msk.bf16.vlgmr.msra.gmra.mrb[0].mxu0 %vm2973_vm6, %v2979_v15  ;;  %v2564_v15 = vld [vmem:[%s3194_s2 + $0x1f0] sm:$0xff]  }
  0x69   : > { %2365 = vmatpush3.bf16.msra.mxu0 %v2552_v10  ;;  %2360 = vmatprep.mubr.msk.bf16.mxu0 %vm2973_vm6, %v3012_v61 }
  0x6a   : > { %2366 = vmatprep.subr.bf16.mxu0 %v2554_v43 }
  0x6b   : > { %2271 = vmatpush3.bf16.msra.mxu1 %v2553_v3 }
  0x6c   : > { %2272 = vmatprep.subr.bf16.mxu1 %v2555_v39 }
  0x6d   : > { %2367 = vmatpush3.bf16.msra.mxu0 %v2554_v43 }
  0x6e   : > { %2265 = vmatmul.mubr.bf16.gmra.mrb[4].mxu1 %v3080_v12  ;;  %2368 = vmatprep.subr.bf16.mxu0 %v2556_v24 }
  0x6f   : > { %2273 = vmatpush3.bf16.msra.mxu1 %v2555_v39  ;;  %2284 = vmatprep.mubr.msk.bf16.mxu1 %vm2973_vm6, %v1919_v53  ;;  %v2562_v53 = vld [vmem:[%s3194_s2 + $0x1e8] sm:$0xff]  }
  0x70   : > { %2274 = vmatprep.subr.bf16.mxu1 %v2557_v26  ;;  %2361 = vmatmul.mubr.msk.bf16.gmra.mrb[4].mxu0 %vm2011_vm7, %v2012_v45 }
  0x71   : > { %2369 = vmatpush3.bf16.msra.mxu0 %v2556_v24  ;;  %2380 = vmatprep.mubr.bf16.mxu0 %v2774_v22  ;;  %v2565_v22 = vld [vmem:[%s3194_s2 + $0xf8] sm:$0xff]  }
  0x72   : > { %2370 = vmatprep.subr.bf16.mxu0 %v2558_v49 }
  0x73   : > { %2275 = vmatpush3.bf16.msra.mxu1 %v2557_v26 }
  0x74   : > { %2276 = vmatprep.subr.bf16.mxu1 %v2559_v33 }
  0x75   : > { %2371 = vmatpush3.bf16.msra.mxu0 %v2558_v49 }
  0x76   : > { %2372 = vmatprep.subr.bf16.mxu0 %v2560_v8 }
  0x77   : > { %2277 = vmatpush3.bf16.msra.mxu1 %v2559_v33 }
  0x78   : > { %2278 = vmatprep.subr.bf16.mxu1 %v2561_v55 }
  0x79   : > { %2373 = vmatpush3.bf16.msra.mxu0 %v2560_v8 }
  0x7a   : > { %2374 = vmatprep.subr.bf16.mxu0 %v2562_v53 }
  0x7b   : > { %2279 = vmatpush3.bf16.msra.mxu1 %v2561_v55 }
  0x7c   : > { %2280 = vmatprep.subr.bf16.mxu1 %v2563_v13 }
  0x7d   : > { %2375 = vmatpush3.bf16.msra.mxu0 %v2562_v53 }
  0x7e   : > { %2376 = vmatprep.subr.bf16.mxu0 %v2564_v15 }
  0x7f   : > { %2281 = vmatpush3.bf16.msra.mxu1 %v2563_v13 }
  0x80   : > { %2282 = vmatprep.subr.bf16.mxu1 %v2565_v22 }
  0x81   : > { %2377 = vmatpush3.bf16.msra.mxu0 %v2564_v15 }
  0x82   : > { %2378 = vmatprep.subr.bf16.mxu0 %v2566_v27 }
  0x83   : > { %2283 = vmatpush3.bf16.msra.mxu1 %v2565_v22 }
  0x84   : > { %2412 = vmatprep.subr.bf16.mxu1 %v2567_v21 }
  0x85   : > { %2379 = vmatpush3.bf16.msra.mxu0 %v2566_v27 }
  0x86   : > { %2285 = vmatmul.mubr.msk.bf16.vlgmr.msra.gmra.mrb[0].mxu1 %vm2973_vm6, %v1922_v4  ;;  %2388 = vmatprep.subr.bf16.mxu0 %v2567_v21 }
  0x87   : > { %2420 = vmatpush3.bf16.msra.mxu1 %v2567_v21  ;;  %2288 = vmatprep.mubr.msk.bf16.mxu1 %vm2973_vm6, %v1925_v5 }
  0x88   : > { %2413 = vmatprep.subr.bf16.mxu1 %v2568_v30  ;;  %2381 = vmatmul.mubr.bf16.vlgmr.msra.gmra.mrb[0].mxu0 %v2868_v44 }
  0x89   : > { %2389 = vmatpush3.bf16.msra.mxu0 %v2567_v21  ;;  %2384 = vmatprep.mubr.bf16.mxu0 %v2903_v63 }
  0x8a   : > { %2390 = vmatprep.subr.bf16.mxu0 %v2568_v30 }
  0x8b   : > { %2421 = vmatpush3.bf16.msra.mxu1 %v2568_v30 }
  0x8c   : > { %2414 = vmatprep.subr.bf16.mxu1 %v2569_v48 }
  0x8d   : > { %2391 = vmatpush3.bf16.msra.mxu0 %v2568_v30 }
  0x8e   : > { %2289 = vmatmul.mubr.msk.bf16.gmra.mrb[4].mxu1 %vm2973_vm6, %v1928_v9  ;;  %2392 = vmatprep.subr.bf16.mxu0 %v2569_v48 }
  0x8f   : > { %2422 = vmatpush3.bf16.msra.mxu1 %v2569_v48  ;;  %2408 = vmatprep.mubr.bf16.mxu1 %v3080_v12 }
  0x90   : > { %2415 = vmatprep.subr.bf16.mxu1 %v2570_v59  ;;  %2385 = vmatmul.mubr.bf16.gmra.mrb[4].mxu0 %v1391_v29 }
  0x91   : > { %2393 = vmatpush3.bf16.msra.mxu0 %v2569_v48  ;;  %2404 = vmatprep.mubr.bf16.mxu0 %v3057_v34 }
  0x92   : > { %2394 = vmatprep.subr.bf16.mxu0 %v2570_v59 }
  0x93   : > { %2423 = vmatpush3.bf16.msra.mxu1 %v2570_v59 }
  0x94   : > { %2416 = vmatprep.subr.bf16.mxu1 %v2571_v19 }
  0x95   : > { %2395 = vmatpush3.bf16.msra.mxu0 %v2570_v59 }
  0x96   : > { %2396 = vmatprep.subr.bf16.mxu0 %v2571_v19 }
  0x97   : > { %2424 = vmatpush3.bf16.msra.mxu1 %v2571_v19 }
  0x98   : > { %2417 = vmatprep.subr.bf16.mxu1 %v2572_v62 }
  0x99   : > { %2397 = vmatpush3.bf16.msra.mxu0 %v2571_v19 }
  0x9a   : > { %2398 = vmatprep.subr.bf16.mxu0 %v2572_v62 }
  0x9b   : > { %2425 = vmatpush3.bf16.msra.mxu1 %v2572_v62 }
  0x9c   : > { %2418 = vmatprep.subr.bf16.mxu1 %v2573_v6 }
  0x9d   : > { %2399 = vmatpush3.bf16.msra.mxu0 %v2572_v62 }
  0x9e   : > { %2400 = vmatprep.subr.bf16.mxu0 %v2573_v6 }
  0x9f   : > { %2426 = vmatpush3.bf16.msra.mxu1 %v2573_v6 }
  0xa0   : > { %2419 = vmatprep.subr.bf16.mxu1 %v2574_v20 }
  0xa1   : > { %2401 = vmatpush3.bf16.msra.mxu0 %v2573_v6 }
  0xa2   : > { %2402 = vmatprep.subr.bf16.mxu0 %v2574_v20 }
  0xa3   : > { %2427 = vmatpush3.bf16.msra.mxu1 %v2574_v20 }
  0xa5   : > { %2403 = vmatpush3.bf16.msra.mxu0 %v2574_v20 }
  0xa6   : > { %2409 = vmatmul.mubr.bf16.vlgmr.msra.gmra.mrb[8].mxu1 %v1530_v37 }
  0xa8   : > { %2405 = vmatmul.mubr.bf16.vlgmr.msra.gmra.mrb[0].mxu0 %v3063_v38 }
 0x159   : > { %v2286_v32 = vpop.f32.mrb[0].mxu1 }
 0x15a   : > { %v919_v44 = vpop.f32.mrb[1].mxu1 }
 0x15b   : > { %v2287_v51 = vpop.f32.mrb[2].mxu1 }
 0x15c   : > { %v922_v63 = vpop.f32.mrb[3].mxu1 }
 0x161   : > { %v2290_v4 = vpop.f32.mrb[4].mxu1 }
 0x162   : > { %v935_v5 = vpop.f32.mrb[5].mxu1 }
 0x163   : > { %v2291_v9 = vpop.f32.mrb[6].mxu1  ;;  %v2386_v29 = vpop.f32.mrb[4].mxu0 }
 0x164   : > { %v938_v14 = vpop.f32.mrb[7].mxu1  ;;  %v2432_v47 = vadd.f32 %v2386_v29, %v2290_v4  ;;  %v1507_v50 = vpop.f32.mrb[5].mxu0 }
 0x165   : > { %v2434_v52 = vadd.f32 %v1507_v50, %v935_v5  ;;  %v2387_v46 = vpop.f32.mrb[6].mxu0 }
 0x166   : > { %v2436_v54 = vadd.f32 %v2387_v46, %v2291_v9  ;;  %v1510_v41 = vpop.f32.mrb[7].mxu0 }
 0x167   : > { %v2438_v35 = vadd.f32 %v1510_v41, %v938_v14 }
 0x179   : > { %v2410_v37 = vpop.f32.mrb[8].mxu1 }
 0x17a   : > { %v2433_v58 = vadd.f32 %v2432_v47, %v2410_v37  ;;  %v1646_v25 = vpop.f32.mrb[9].mxu1 }
 0x17b   : > { %v2435_v2 = vadd.f32 %v2434_v52, %v1646_v25  ;;  %v2411_v60 = vpop.f32.mrb[10].mxu1  ;;  %v2406_v7 = vpop.f32.mrb[0].mxu0 }
 0x17c   : > { %v2437_v61 = vadd.f32 %v2436_v54, %v2411_v60  ;;  %v1649_v0 = vpop.f32.mrb[11].mxu1  ;;  %v2428_v16 = vadd.f32 %v2406_v7, %v2286_v32  ;;  %v1630_v17 = vpop.f32.mrb[1].mxu0 }
 0x17d   : > { %v2439_v42 = vadd.f32 %v2438_v35, %v1649_v0  ;;  %v2429_v18 = vadd.f32 %v1630_v17, %v919_v44  ;;  %v2407_v56 = vpop.f32.mrb[2].mxu0 }
 0x17e   : > { %v2083_v1 = vpack.c.bf16 %v2437_v61, %v2433_v58  ;;  %v2430_v57 = vadd.f32 %v2407_v56, %v2287_v51  ;;  %v1633_v40 = vpop.f32.mrb[3].mxu0 }
 0x17f   : > { %v2078_v11 = vpack.c.bf16 %v2439_v42, %v2435_v2  ;;  %v2431_v23 = vadd.f32 %v1633_v40, %v922_v63 }
 0x180   : > { %2087 = vst [vmem:[%s204_s9 + $0x18] sm:$0xff] %v2083_v1   ;;  %v2073_v28 = vpack.c.bf16 %v2430_v57, %v2428_v16 }
 0x181   : > { %2086 = vst [vmem:[%s204_s9 + $0x10] sm:$0xff] %v2078_v11   ;;  %v1670_v31 = vadd.f32 %v2431_v23, %v2429_v18  ;;  %v2068_v34 = vpack.c.bf16 %v2431_v23, %v2429_v18 }
 0x182   : > { %2085 = vst [vmem:[%s204_s9 + $0x8] sm:$0xff] %v2073_v28  }
 0x183   : > { %v1671_v36 = vadd.f32 %v2428_v16, %v1670_v31  ;;  %2069 = vst [vmem:[%s204_s9] sm:$0xff] %v2068_v34  }
 0x185   : > { %v1672_v38 = vadd.f32 %v2430_v57, %v1671_v36 }
 0x187   : > { %v1673_v3 = vadd.f32 %v2435_v2, %v1672_v38 }
 0x189   : > { %v1674_v10 = vadd.f32 %v2439_v42, %v1673_v3 }
 0x18b   : > { %v1675_v39 = vadd.f32 %v2433_v58, %v1674_v10 }
 0x18d   : > { %v1676_v43 = vadd.f32 %v2437_v61, %v1675_v39 }
 0x18f   : > { %v1677_v12 = vrot.slane %v1676_v43, 4 }
 0x191   : > { %v1678_v26 = vadd.f32 %v1677_v12, %v1676_v43 }
 0x193   : > { %v1679_v24 = vrot.slane %v1678_v26, 2 }
 0x195   : > { %v1680_v33 = vadd.f32 %v1679_v24, %v1678_v26 }
 0x197   : > { %v1681_v45 = vrot.slane %v1680_v33, 1 }
 0x199   : > { %v1682_v49 = vadd.f32 %v1681_v45, %v1680_v33 }
 0x19b   : > { %v1683_v55 = vmul.f32 0.015625, %v1682_v49  ;;  %1713 = vst [vmem:[%s2651_s11] sm:$0x1] %v1682_v49 }
 0x19d   : > { %v1684_v8 = vsub.f32 %v2429_v18, %v1683_v55  ;;  %v1685_v13 = vsub.f32 %v2431_v23, %v1683_v55  ;;  %v1686_v53 = vsub.f32 %v2428_v16, %v1683_v55  ;;  %v1687_v22 = vsub.f32 %v2430_v57, %v1683_v55 }
 0x19e   : > { %v1688_v15 = vsub.f32 %v2435_v2, %v1683_v55  ;;  %v1689_v21 = vsub.f32 %v2439_v42, %v1683_v55  ;;  %v1690_v27 = vsub.f32 %v2433_v58, %v1683_v55  ;;  %v1691_v30 = vsub.f32 %v2437_v61, %v1683_v55 }
 0x19f   : > { %v1692_v48 = vmul.f32 %v1684_v8, %v1684_v8  ;;  %v1693_v59 = vmul.f32 %v1685_v13, %v1685_v13  ;;  %v1694_v19 = vmul.f32 %v1686_v53, %v1686_v53  ;;  %v1695_v6 = vmul.f32 %v1687_v22, %v1687_v22 }
 0x1a0   : > { %v1696_v32 = vmul.f32 %v1688_v15, %v1688_v15  ;;  %v1697_v51 = vmul.f32 %v1689_v21, %v1689_v21  ;;  %v1698_v4 = vmul.f32 %v1690_v27, %v1690_v27  ;;  %v1699_v9 = vmul.f32 %v1691_v30, %v1691_v30 }
 0x1a1   : > { %v1700_v62 = vadd.f32 %v1693_v59, %v1692_v48 }
 0x1a3   : > { %v1701_v20 = vadd.f32 %v1700_v62, %v1694_v19 }
 0x1a5   : > { %v1702_v44 = vadd.f32 %v1701_v20, %v1695_v6 }
 0x1a7   : > { %v1703_v63 = vadd.f32 %v1702_v44, %v1696_v32 }
 0x1a9   : > { %v1704_v5 = vadd.f32 %v1703_v63, %v1697_v51 }
 0x1ab   : > { %v1705_v14 = vadd.f32 %v1704_v5, %v1698_v4 }
 0x1ad   : > { %v1706_v29 = vadd.f32 %v1705_v14, %v1699_v9 }
 0x1af   : > { %v1707_v47 = vrot.slane %v1706_v29, 4 }
 0x1b1   : > { %v1708_v50 = vadd.f32 %v1707_v47, %v1706_v29 }
 0x1b3   : > { %v1709_v52 = vrot.slane %v1708_v50, 2 }
 0x1b5   : > { %v1710_v46 = vadd.f32 %v1709_v52, %v1708_v50 }
 0x1b7   : > { %v1711_v54 = vrot.slane %v1710_v46, 1 }
 0x1b9   : > { %v1712_v41 = vadd.f32 %v1711_v54, %v1710_v46 }
 0x1bb   : > { %1714 = vst [vmem:[%s2651_s11 + $0x1] sm:$0x1] %v1712_v41 }
 0x1bc PF: > { %s15_s15 = sadd.s32 1, %s2581_s15  }
 0x1bd   : > { %p12_p4 = scmp.ge.s32.totalorder %s15_s15, 4  }
 0x1bf   :  { %14 = sbr.rel (!%p12_p4) target bundleno = 1 (0x1), region = 82 }

</bundles_post_ra>
